<compile_context>
chip_gen: v7x
topology: tpu7x:2x2x1
jax: 0.10.0
libtpu: 0.0.40
codegen_flags: <defaults>
</compile_context>

<pallas_src>
import functools

import jax
import jax.numpy as jnp
from jax import lax
from jax.experimental import pallas as pl
from jax.experimental.pallas import tpu as pltpu

LN_EPS = 1e-12


def order_embeddings_kernel(
    ids_ref,                     # scalar-prefetch: (R_pad,) int32 word ids (SMEM)
    word_hbm,                    # word-embedding table, stays in HBM (pl.ANY)
    tt_ref, pid_ref,             # (tile_rows, 1) int32 token-type / position ids (VMEM)
    pos_tab_ref, tok_tab_ref,    # full small tables (Vp, H) / (Vt, H) in VMEM
    gamma_ref, beta_ref,         # (1, H) LayerNorm params
    out_ref,                     # (tile_rows, H) output block
    wbuf, sems,                  # scratch: (2*tile_rows, H) f32 VMEM, DMA sems (2,)
    *, tile_rows, n_seq):
    p = pl.program_id(0)
    s = pl.program_id(1)
    tile = p * n_seq + s
    slot = s & 1

    def issue_gather(tile_idx, slot_idx):
        # One async row-DMA per gathered word id; all copies of a slot share one
        # DMA semaphore. Ids were already clamped in the wrapper.
        base = tile_idx * tile_rows
        dst0 = slot_idx * tile_rows
        for i in range(tile_rows):
            wid = ids_ref[base + i]
            pltpu.make_async_copy(
                word_hbm.at[pl.ds(wid, 1), :],
                wbuf.at[pl.ds(dst0 + i, 1), :],
                sems.at[slot_idx]).start()

    # Prime: the first sequential step of each parallel chunk gathers its own rows.
    @pl.when(s == 0)
    def _():
        issue_gather(tile, slot)

    # Prefetch the NEXT step's rows into the other slot *before* any wait, so a full
    # step of compute / output writeback hides the gather latency.
    if n_seq > 1:
        @pl.when(s + 1 < n_seq)
        def _():
            issue_gather(tile + 1, 1 - slot)

    # Position + token-type rows: tables are tiny and VMEM-resident, so select rows
    # in-register with a one-hot MXU matmul (fp32 contract precision) -- no DMAs.
    vp = pos_tab_ref.shape[0]
    vt = tok_tab_ref.shape[0]
    pos_oh = (lax.broadcasted_iota(jnp.int32, (tile_rows, vp), 1)
              == pid_ref[...]).astype(jnp.float32)
    tok_oh = (lax.broadcasted_iota(jnp.int32, (tile_rows, vt), 1)
              == tt_ref[...]).astype(jnp.float32)
    small = (jnp.dot(pos_oh, pos_tab_ref[...],
                     precision=jax.lax.Precision.HIGHEST,
                     preferred_element_type=jnp.float32)
             + jnp.dot(tok_oh, tok_tab_ref[...],
                       precision=jax.lax.Precision.HIGHEST,
                       preferred_element_type=jnp.float32))

    # Wait for this slot's word-row gathers (shared semaphore per slot; the next
    # slot's descriptors were all issued above, off this critical path).
    dst0 = slot * tile_rows
    for i in range(tile_rows):
        pltpu.make_async_copy(
            word_hbm.at[pl.ds(0, 1), :],
            wbuf.at[pl.ds(dst0 + i, 1), :],
            sems.at[slot]).wait()

    off = pl.multiple_of(slot * tile_rows, 8)
    words = wbuf[pl.ds(off, tile_rows), :]

    emb = words + small

    # LayerNorm, eps = 1e-12 (two-pass, mean-centered variance for stability).
    mean = jnp.mean(emb, axis=-1, keepdims=True)
    cent = emb - mean
    var = jnp.mean(cent * cent, axis=-1, keepdims=True)
    inv_std = lax.rsqrt(var + LN_EPS)
    out = cent * inv_std * gamma_ref[0, :] + beta_ref[0, :]

    # Dropout: identity at inference time.
    out_ref[...] = out


def order_embeddings(input_ids, token_type_ids, params, *, tile_rows=None):
    B, S = input_ids.shape
    Vw, H = params["word"].shape
    Vp, _ = params["pos"].shape
    Vt, _ = params["tok"].shape
    assert S <= Vp, "sequence length exceeds position-embedding table"

    if token_type_ids is None:
        token_type_ids = jnp.zeros_like(input_ids)

    R = B * S
    if tile_rows is None:
        tile_rows = min(256, ((R + 7) // 8) * 8)
    tile_rows = max(8, (tile_rows // 8) * 8)
    R_pad = ((R + tile_rows - 1) // tile_rows) * tile_rows
    num_tiles = R_pad // tile_rows
    # Two parallel chunks only when each chunk still has >=2 sequential steps, so the
    # double-buffered gather stays effective and both v7x TensorCores get work.
    if num_tiles >= 4 and num_tiles % 2 == 0:
        n_par, n_seq = 2, num_tiles // 2
    else:
        n_par, n_seq = 1, num_tiles

    # Vectorized id prep in the wrapper (keeps clamps off the kernel's scalar path).
    # Note: out-of-range ids are clamped to valid rows (PyTorch would raise).
    wids = jnp.clip(input_ids.reshape(-1), 0, Vw - 1).astype(jnp.int32)
    tids = jnp.clip(token_type_ids.reshape(-1), 0, Vt - 1).astype(jnp.int32)
    pids = jnp.tile(jnp.arange(S, dtype=jnp.int32), B)
    pad = R_pad - R
    if pad:
        zpad = jnp.zeros((pad,), jnp.int32)
        wids = jnp.concatenate([wids, zpad])
        tids = jnp.concatenate([tids, zpad])
        pids = jnp.concatenate([pids, zpad])
    tids2 = tids.reshape(R_pad, 1)
    pids2 = pids.reshape(R_pad, 1)

    kernel = functools.partial(order_embeddings_kernel,
                               tile_rows=tile_rows, n_seq=n_seq)

    out = pl.pallas_call(
        kernel,
        out_shape=jax.ShapeDtypeStruct((R_pad, H), jnp.float32),
        grid_spec=pltpu.PrefetchScalarGridSpec(
            num_scalar_prefetch=1,                       # word ids -> SMEM
            grid=(n_par, n_seq),
            in_specs=[
                pl.BlockSpec(memory_space=pl.ANY),                                   # word table (HBM)
                pl.BlockSpec((tile_rows, 1), lambda p, s, ids: (p * n_seq + s, 0)),  # token-type ids
                pl.BlockSpec((tile_rows, 1), lambda p, s, ids: (p * n_seq + s, 0)),  # position ids
                pl.BlockSpec((Vp, H), lambda p, s, ids: (0, 0)),                     # pos table (VMEM)
                pl.BlockSpec((Vt, H), lambda p, s, ids: (0, 0)),                     # tok table (VMEM)
                pl.BlockSpec((1, H), lambda p, s, ids: (0, 0)),                      # gamma
                pl.BlockSpec((1, H), lambda p, s, ids: (0, 0)),                      # beta
            ],
            out_specs=pl.BlockSpec((tile_rows, H),
                                   lambda p, s, ids: (p * n_seq + s, 0)),
            scratch_shapes=[
                pltpu.VMEM((2 * tile_rows, H), jnp.float32),   # double-buffered word rows
                pltpu.SemaphoreType.DMA((2,)),                 # one DMA semaphore per slot
            ],
        ),
        compiler_params=pltpu.CompilerParams(
            dimension_semantics=("parallel", "arbitrary"),
            vmem_limit_bytes=64 * 1024 * 1024),
    )(wids, params["word"], tids2, pids2,
      params["pos"], params["tok"], params["gamma"], params["beta"])

    return out[:R].reshape(B, S, H)


def init_params(key, max_position_embeddings, hidden_size):
    kw, kp, kt = jax.random.split(key, 3)
    word = jax.random.normal(kw, (max_position_embeddings, hidden_size), jnp.float32)
    pos = jax.random.normal(kp, (max_position_embeddings, hidden_size), jnp.float32)
    tok = jax.random.normal(kt, (max_position_embeddings, hidden_size), jnp.float32)
    # padding_idx semantics from nn.Embedding: zero that row.
    word = word.at[1].set(0.0)   # padding_idx=1
    pos = pos.at[1].set(0.0)     # padding_idx=1
    tok = tok.at[0].set(0.0)     # padding_idx=0
    gamma = jnp.ones((1, hidden_size), jnp.float32)   # LayerNorm default init
    beta = jnp.zeros((1, hidden_size), jnp.float32)
    return {"word": word, "pos": pos, "tok": tok, "gamma": gamma, "beta": beta}


def reference(input_ids, token_type_ids, params):
    B, S = input_ids.shape
    if token_type_ids is None:
        token_type_ids = jnp.zeros_like(input_ids)
    w = params["word"][input_ids]                                   # (B, S, H)
    p = params["pos"][jnp.arange(S)][None, :, :]                    # (1, S, H)
    t = params["tok"][token_type_ids]                               # (B, S, H)
    e = w + p + t
    mean = e.mean(-1, keepdims=True)
    var = ((e - mean) ** 2).mean(-1, keepdims=True)
    return (e - mean) / jnp.sqrt(var + LN_EPS) * params["gamma"][0] + params["beta"][0]


if __name__ == "__main__":
    key = jax.random.PRNGKey(0)

    def run_case(k, B, S, V, H, tile_rows, nontrivial_tt):
        kp, ki, kt = jax.random.split(k, 3)
        params = init_params(kp, V, H)
        input_ids = jax.random.randint(ki, (B, S), 0, V, dtype=jnp.int32)
        tt = (jax.random.randint(kt, (B, S), 0, V, dtype=jnp.int32)
              if nontrivial_tt else None)   # forward's None default -> zeros
        out = jax.block_until_ready(
            order_embeddings(input_ids, tt, params, tile_rows=tile_rows))
        ref = reference(input_ids, tt, params)
        assert out.shape == (B, S, H)
        assert jnp.allclose(out, ref, atol=1e-3, rtol=1e-3), \
            f"mismatch vs pure-JAX reference (B={B}, S={S}, H={H})"

    k1, k2, k3 = jax.random.split(key, 3)
    # Case 1: small module-like shapes; single tile (prime-only path), token_type_ids=None.
    run_case(k1, B=2, S=8, V=32, H=32, tile_rows=None, nontrivial_tt=False)
    # Case 2: 4 tiles -> 2 parallel chunks x 2 sequential steps (double-buffered gather).
    run_case(k2, B=4, S=16, V=64, H=128, tile_rows=16, nontrivial_tt=True)
    # Case 3: ragged row count -> padding path + sequential prefetch across 2 steps.
    run_case(k3, B=3, S=10, V=64, H=128, tile_rows=16, nontrivial_tt=True)

    print("KERNEL_OK")
</pallas_src>

<mosaic_0001>
module attributes {stable_mosaic.version = 11 : i64} {
  func.func @order_embeddings_kernel(%arg0: i32, %arg1: i32, %arg2: memref<16xi32, #tpu.memory_space<smem>>, %arg3: memref<32x32xf32, #tpu.memory_space<any>>, %arg4: memref<16x1xi32, #tpu.memory_space<vmem>>, %arg5: memref<16x1xi32, #tpu.memory_space<vmem>>, %arg6: memref<32x32xf32, #tpu.memory_space<vmem>>, %arg7: memref<32x32xf32, #tpu.memory_space<vmem>>, %arg8: memref<1x32xf32, #tpu.memory_space<vmem>>, %arg9: memref<1x32xf32, #tpu.memory_space<vmem>>, %arg10: memref<16x32xf32, #tpu.memory_space<vmem>>, %arg11: memref<32x32xf32, #tpu.memory_space<vmem>>, %arg12: memref<2x!tpu.dma_semaphore, #tpu.memory_space<semaphore_mem>>) attributes {dimension_semantics = [#tpu.dimension_semantics<parallel>, #tpu.dimension_semantics<arbitrary>], iteration_bounds = array<i64: 1, 1>, scalar_prefetch = 1 : i64, scratch_operands = 2 : i64, tpu.core_type = #tpu.core_type<tc>, window_params = [{}, {transform_indices = @transform_1, window_bounds = array<i64: 16, 1>}, {transform_indices = @transform_2, window_bounds = array<i64: 16, 1>}, {pipeline_mode = #tpu.pipeline_mode<synchronous>, transform_indices = @transform_3, window_bounds = array<i64: 32, 32>}, {pipeline_mode = #tpu.pipeline_mode<synchronous>, transform_indices = @transform_4, window_bounds = array<i64: 32, 32>}, {pipeline_mode = #tpu.pipeline_mode<synchronous>, transform_indices = @transform_5, window_bounds = array<i64: 1, 32>}, {pipeline_mode = #tpu.pipeline_mode<synchronous>, transform_indices = @transform_6, window_bounds = array<i64: 1, 32>}, {transform_indices = @transform_7, window_bounds = array<i64: 16, 32>}]} {
    %c1_i32 = arith.constant 1 : i32
    %0 = arith.muli %arg0, %c1_i32 : i32
    %1 = arith.addi %0, %arg1 : i32
    %c1_i32_0 = arith.constant 1 : i32
    %2 = arith.andi %arg1, %c1_i32_0 : i32
    %c0_i32 = arith.constant 0 : i32
    %3 = arith.cmpi eq, %arg1, %c0_i32 : i32
    %4 = arith.extui %3 : i1 to i32
    %c0_i32_1 = arith.constant 0 : i32
    %5 = arith.cmpi ne, %4, %c0_i32_1 : i32
    scf.if %5 {
      %c16_i32_73 = arith.constant 16 : i32
      %136 = arith.muli %1, %c16_i32_73 : i32
      %c16_i32_74 = arith.constant 16 : i32
      %137 = arith.muli %2, %c16_i32_74 : i32
      %c0_i32_75 = arith.constant 0 : i32
      %138 = arith.addi %136, %c0_i32_75 : i32
      %139 = arith.index_cast %138 : i32 to index
      %140 = memref.load %arg2[%139] : memref<16xi32, #tpu.memory_space<smem>>
      %c0_i32_76 = arith.constant 0 : i32
      %141 = arith.addi %137, %c0_i32_76 : i32
      %c0_i32_77 = arith.constant 0 : i32
      %142 = tpu.memref_slice %arg3[%140, %c0_i32_77] : memref<32x32xf32, #tpu.memory_space<any>> -> memref<1x32xf32, #tpu.memory_space<any>>
      %c0_i32_78 = arith.constant 0 : i32
      %143 = tpu.memref_slice %arg11[%141, %c0_i32_78] : memref<32x32xf32, #tpu.memory_space<vmem>> -> memref<1x32xf32, #tpu.memory_space<vmem>>
      %144 = tpu.memref_slice %arg12[%2] : memref<2x!tpu.dma_semaphore, #tpu.memory_space<semaphore_mem>> -> memref<1x!tpu.dma_semaphore, #tpu.memory_space<semaphore_mem>>
      %145 = tpu.memref_squeeze %144 : memref<1x!tpu.dma_semaphore, #tpu.memory_space<semaphore_mem>> -> memref<!tpu.dma_semaphore, #tpu.memory_space<semaphore_mem>>
      tpu.enqueue_dma source(%142 : memref<1x32xf32, #tpu.memory_space<any>>) target(%143 : memref<1x32xf32, #tpu.memory_space<vmem>>) target_semaphore(%145 : memref<!tpu.dma_semaphore, #tpu.memory_space<semaphore_mem>>)
      %c1_i32_79 = arith.constant 1 : i32
      %146 = arith.addi %136, %c1_i32_79 : i32
      %147 = arith.index_cast %146 : i32 to index
      %148 = memref.load %arg2[%147] : memref<16xi32, #tpu.memory_space<smem>>
      %c1_i32_80 = arith.constant 1 : i32
      %149 = arith.addi %137, %c1_i32_80 : i32
      %c0_i32_81 = arith.constant 0 : i32
      %150 = tpu.memref_slice %arg3[%148, %c0_i32_81] : memref<32x32xf32, #tpu.memory_space<any>> -> memref<1x32xf32, #tpu.memory_space<any>>
      %c0_i32_82 = arith.constant 0 : i32
      %151 = tpu.memref_slice %arg11[%149, %c0_i32_82] : memref<32x32xf32, #tpu.memory_space<vmem>> -> memref<1x32xf32, #tpu.memory_space<vmem>>
      %152 = tpu.memref_slice %arg12[%2] : memref<2x!tpu.dma_semaphore, #tpu.memory_space<semaphore_mem>> -> memref<1x!tpu.dma_semaphore, #tpu.memory_space<semaphore_mem>>
      %153 = tpu.memref_squeeze %152 : memref<1x!tpu.dma_semaphore, #tpu.memory_space<semaphore_mem>> -> memref<!tpu.dma_semaphore, #tpu.memory_space<semaphore_mem>>
      tpu.enqueue_dma source(%150 : memref<1x32xf32, #tpu.memory_space<any>>) target(%151 : memref<1x32xf32, #tpu.memory_space<vmem>>) target_semaphore(%153 : memref<!tpu.dma_semaphore, #tpu.memory_space<semaphore_mem>>)
      %c2_i32_83 = arith.constant 2 : i32
      %154 = arith.addi %136, %c2_i32_83 : i32
      %155 = arith.index_cast %154 : i32 to index
      %156 = memref.load %arg2[%155] : memref<16xi32, #tpu.memory_space<smem>>
      %c2_i32_84 = arith.constant 2 : i32
      %157 = arith.addi %137, %c2_i32_84 : i32
      %c0_i32_85 = arith.constant 0 : i32
      %158 = tpu.memref_slice %arg3[%156, %c0_i32_85] : memref<32x32xf32, #tpu.memory_space<any>> -> memref<1x32xf32, #tpu.memory_space<any>>
      %c0_i32_86 = arith.constant 0 : i32
      %159 = tpu.memref_slice %arg11[%157, %c0_i32_86] : memref<32x32xf32, #tpu.memory_space<vmem>> -> memref<1x32xf32, #tpu.memory_space<vmem>>
      %160 = tpu.memref_slice %arg12[%2] : memref<2x!tpu.dma_semaphore, #tpu.memory_space<semaphore_mem>> -> memref<1x!tpu.dma_semaphore, #tpu.memory_space<semaphore_mem>>
      %161 = tpu.memref_squeeze %160 : memref<1x!tpu.dma_semaphore, #tpu.memory_space<semaphore_mem>> -> memref<!tpu.dma_semaphore, #tpu.memory_space<semaphore_mem>>
      tpu.enqueue_dma source(%158 : memref<1x32xf32, #tpu.memory_space<any>>) target(%159 : memref<1x32xf32, #tpu.memory_space<vmem>>) target_semaphore(%161 : memref<!tpu.dma_semaphore, #tpu.memory_space<semaphore_mem>>)
      %c3_i32_87 = arith.constant 3 : i32
      %162 = arith.addi %136, %c3_i32_87 : i32
      %163 = arith.index_cast %162 : i32 to index
      %164 = memref.load %arg2[%163] : memref<16xi32, #tpu.memory_space<smem>>
      %c3_i32_88 = arith.constant 3 : i32
      %165 = arith.addi %137, %c3_i32_88 : i32
      %c0_i32_89 = arith.constant 0 : i32
      %166 = tpu.memref_slice %arg3[%164, %c0_i32_89] : memref<32x32xf32, #tpu.memory_space<any>> -> memref<1x32xf32, #tpu.memory_space<any>>
      %c0_i32_90 = arith.constant 0 : i32
      %167 = tpu.memref_slice %arg11[%165, %c0_i32_90] : memref<32x32xf32, #tpu.memory_space<vmem>> -> memref<1x32xf32, #tpu.memory_space<vmem>>
      %168 = tpu.memref_slice %arg12[%2] : memref<2x!tpu.dma_semaphore, #tpu.memory_space<semaphore_mem>> -> memref<1x!tpu.dma_semaphore, #tpu.memory_space<semaphore_mem>>
      %169 = tpu.memref_squeeze %168 : memref<1x!tpu.dma_semaphore, #tpu.memory_space<semaphore_mem>> -> memref<!tpu.dma_semaphore, #tpu.memory_space<semaphore_mem>>
      tpu.enqueue_dma source(%166 : memref<1x32xf32, #tpu.memory_space<any>>) target(%167 : memref<1x32xf32, #tpu.memory_space<vmem>>) target_semaphore(%169 : memref<!tpu.dma_semaphore, #tpu.memory_space<semaphore_mem>>)
      %c4_i32_91 = arith.constant 4 : i32
      %170 = arith.addi %136, %c4_i32_91 : i32
      %171 = arith.index_cast %170 : i32 to index
      %172 = memref.load %arg2[%171] : memref<16xi32, #tpu.memory_space<smem>>
      %c4_i32_92 = arith.constant 4 : i32
      %173 = arith.addi %137, %c4_i32_92 : i32
      %c0_i32_93 = arith.constant 0 : i32
      %174 = tpu.memref_slice %arg3[%172, %c0_i32_93] : memref<32x32xf32, #tpu.memory_space<any>> -> memref<1x32xf32, #tpu.memory_space<any>>
      %c0_i32_94 = arith.constant 0 : i32
      %175 = tpu.memref_slice %arg11[%173, %c0_i32_94] : memref<32x32xf32, #tpu.memory_space<vmem>> -> memref<1x32xf32, #tpu.memory_space<vmem>>
      %176 = tpu.memref_slice %arg12[%2] : memref<2x!tpu.dma_semaphore, #tpu.memory_space<semaphore_mem>> -> memref<1x!tpu.dma_semaphore, #tpu.memory_space<semaphore_mem>>
      %177 = tpu.memref_squeeze %176 : memref<1x!tpu.dma_semaphore, #tpu.memory_space<semaphore_mem>> -> memref<!tpu.dma_semaphore, #tpu.memory_space<semaphore_mem>>
      tpu.enqueue_dma source(%174 : memref<1x32xf32, #tpu.memory_space<any>>) target(%175 : memref<1x32xf32, #tpu.memory_space<vmem>>) target_semaphore(%177 : memref<!tpu.dma_semaphore, #tpu.memory_space<semaphore_mem>>)
      %c5_i32_95 = arith.constant 5 : i32
      %178 = arith.addi %136, %c5_i32_95 : i32
      %179 = arith.index_cast %178 : i32 to index
      %180 = memref.load %arg2[%179] : memref<16xi32, #tpu.memory_space<smem>>
      %c5_i32_96 = arith.constant 5 : i32
      %181 = arith.addi %137, %c5_i32_96 : i32
      %c0_i32_97 = arith.constant 0 : i32
      %182 = tpu.memref_slice %arg3[%180, %c0_i32_97] : memref<32x32xf32, #tpu.memory_space<any>> -> memref<1x32xf32, #tpu.memory_space<any>>
      %c0_i32_98 = arith.constant 0 : i32
      %183 = tpu.memref_slice %arg11[%181, %c0_i32_98] : memref<32x32xf32, #tpu.memory_space<vmem>> -> memref<1x32xf32, #tpu.memory_space<vmem>>
      %184 = tpu.memref_slice %arg12[%2] : memref<2x!tpu.dma_semaphore, #tpu.memory_space<semaphore_mem>> -> memref<1x!tpu.dma_semaphore, #tpu.memory_space<semaphore_mem>>
      %185 = tpu.memref_squeeze %184 : memref<1x!tpu.dma_semaphore, #tpu.memory_space<semaphore_mem>> -> memref<!tpu.dma_semaphore, #tpu.memory_space<semaphore_mem>>
      tpu.enqueue_dma source(%182 : memref<1x32xf32, #tpu.memory_space<any>>) target(%183 : memref<1x32xf32, #tpu.memory_space<vmem>>) target_semaphore(%185 : memref<!tpu.dma_semaphore, #tpu.memory_space<semaphore_mem>>)
      %c6_i32_99 = arith.constant 6 : i32
      %186 = arith.addi %136, %c6_i32_99 : i32
      %187 = arith.index_cast %186 : i32 to index
      %188 = memref.load %arg2[%187] : memref<16xi32, #tpu.memory_space<smem>>
      %c6_i32_100 = arith.constant 6 : i32
      %189 = arith.addi %137, %c6_i32_100 : i32
      %c0_i32_101 = arith.constant 0 : i32
      %190 = tpu.memref_slice %arg3[%188, %c0_i32_101] : memref<32x32xf32, #tpu.memory_space<any>> -> memref<1x32xf32, #tpu.memory_space<any>>
      %c0_i32_102 = arith.constant 0 : i32
      %191 = tpu.memref_slice %arg11[%189, %c0_i32_102] : memref<32x32xf32, #tpu.memory_space<vmem>> -> memref<1x32xf32, #tpu.memory_space<vmem>>
      %192 = tpu.memref_slice %arg12[%2] : memref<2x!tpu.dma_semaphore, #tpu.memory_space<semaphore_mem>> -> memref<1x!tpu.dma_semaphore, #tpu.memory_space<semaphore_mem>>
      %193 = tpu.memref_squeeze %192 : memref<1x!tpu.dma_semaphore, #tpu.memory_space<semaphore_mem>> -> memref<!tpu.dma_semaphore, #tpu.memory_space<semaphore_mem>>
      tpu.enqueue_dma source(%190 : memref<1x32xf32, #tpu.memory_space<any>>) target(%191 : memref<1x32xf32, #tpu.memory_space<vmem>>) target_semaphore(%193 : memref<!tpu.dma_semaphore, #tpu.memory_space<semaphore_mem>>)
      %c7_i32_103 = arith.constant 7 : i32
      %194 = arith.addi %136, %c7_i32_103 : i32
      %195 = arith.index_cast %194 : i32 to index
      %196 = memref.load %arg2[%195] : memref<16xi32, #tpu.memory_space<smem>>
      %c7_i32_104 = arith.constant 7 : i32
      %197 = arith.addi %137, %c7_i32_104 : i32
      %c0_i32_105 = arith.constant 0 : i32
      %198 = tpu.memref_slice %arg3[%196, %c0_i32_105] : memref<32x32xf32, #tpu.memory_space<any>> -> memref<1x32xf32, #tpu.memory_space<any>>
      %c0_i32_106 = arith.constant 0 : i32
      %199 = tpu.memref_slice %arg11[%197, %c0_i32_106] : memref<32x32xf32, #tpu.memory_space<vmem>> -> memref<1x32xf32, #tpu.memory_space<vmem>>
      %200 = tpu.memref_slice %arg12[%2] : memref<2x!tpu.dma_semaphore, #tpu.memory_space<semaphore_mem>> -> memref<1x!tpu.dma_semaphore, #tpu.memory_space<semaphore_mem>>
      %201 = tpu.memref_squeeze %200 : memref<1x!tpu.dma_semaphore, #tpu.memory_space<semaphore_mem>> -> memref<!tpu.dma_semaphore, #tpu.memory_space<semaphore_mem>>
      tpu.enqueue_dma source(%198 : memref<1x32xf32, #tpu.memory_space<any>>) target(%199 : memref<1x32xf32, #tpu.memory_space<vmem>>) target_semaphore(%201 : memref<!tpu.dma_semaphore, #tpu.memory_space<semaphore_mem>>)
      %c8_i32_107 = arith.constant 8 : i32
      %202 = arith.addi %136, %c8_i32_107 : i32
      %203 = arith.index_cast %202 : i32 to index
      %204 = memref.load %arg2[%203] : memref<16xi32, #tpu.memory_space<smem>>
      %c8_i32_108 = arith.constant 8 : i32
      %205 = arith.addi %137, %c8_i32_108 : i32
      %c0_i32_109 = arith.constant 0 : i32
      %206 = tpu.memref_slice %arg3[%204, %c0_i32_109] : memref<32x32xf32, #tpu.memory_space<any>> -> memref<1x32xf32, #tpu.memory_space<any>>
      %c0_i32_110 = arith.constant 0 : i32
      %207 = tpu.memref_slice %arg11[%205, %c0_i32_110] : memref<32x32xf32, #tpu.memory_space<vmem>> -> memref<1x32xf32, #tpu.memory_space<vmem>>
      %208 = tpu.memref_slice %arg12[%2] : memref<2x!tpu.dma_semaphore, #tpu.memory_space<semaphore_mem>> -> memref<1x!tpu.dma_semaphore, #tpu.memory_space<semaphore_mem>>
      %209 = tpu.memref_squeeze %208 : memref<1x!tpu.dma_semaphore, #tpu.memory_space<semaphore_mem>> -> memref<!tpu.dma_semaphore, #tpu.memory_space<semaphore_mem>>
      tpu.enqueue_dma source(%206 : memref<1x32xf32, #tpu.memory_space<any>>) target(%207 : memref<1x32xf32, #tpu.memory_space<vmem>>) target_semaphore(%209 : memref<!tpu.dma_semaphore, #tpu.memory_space<semaphore_mem>>)
      %c9_i32_111 = arith.constant 9 : i32
      %210 = arith.addi %136, %c9_i32_111 : i32
      %211 = arith.index_cast %210 : i32 to index
      %212 = memref.load %arg2[%211] : memref<16xi32, #tpu.memory_space<smem>>
      %c9_i32_112 = arith.constant 9 : i32
      %213 = arith.addi %137, %c9_i32_112 : i32
      %c0_i32_113 = arith.constant 0 : i32
      %214 = tpu.memref_slice %arg3[%212, %c0_i32_113] : memref<32x32xf32, #tpu.memory_space<any>> -> memref<1x32xf32, #tpu.memory_space<any>>
      %c0_i32_114 = arith.constant 0 : i32
      %215 = tpu.memref_slice %arg11[%213, %c0_i32_114] : memref<32x32xf32, #tpu.memory_space<vmem>> -> memref<1x32xf32, #tpu.memory_space<vmem>>
      %216 = tpu.memref_slice %arg12[%2] : memref<2x!tpu.dma_semaphore, #tpu.memory_space<semaphore_mem>> -> memref<1x!tpu.dma_semaphore, #tpu.memory_space<semaphore_mem>>
      %217 = tpu.memref_squeeze %216 : memref<1x!tpu.dma_semaphore, #tpu.memory_space<semaphore_mem>> -> memref<!tpu.dma_semaphore, #tpu.memory_space<semaphore_mem>>
      tpu.enqueue_dma source(%214 : memref<1x32xf32, #tpu.memory_space<any>>) target(%215 : memref<1x32xf32, #tpu.memory_space<vmem>>) target_semaphore(%217 : memref<!tpu.dma_semaphore, #tpu.memory_space<semaphore_mem>>)
      %c10_i32_115 = arith.constant 10 : i32
      %218 = arith.addi %136, %c10_i32_115 : i32
      %219 = arith.index_cast %218 : i32 to index
      %220 = memref.load %arg2[%219] : memref<16xi32, #tpu.memory_space<smem>>
      %c10_i32_116 = arith.constant 10 : i32
      %221 = arith.addi %137, %c10_i32_116 : i32
      %c0_i32_117 = arith.constant 0 : i32
      %222 = tpu.memref_slice %arg3[%220, %c0_i32_117] : memref<32x32xf32, #tpu.memory_space<any>> -> memref<1x32xf32, #tpu.memory_space<any>>
      %c0_i32_118 = arith.constant 0 : i32
      %223 = tpu.memref_slice %arg11[%221, %c0_i32_118] : memref<32x32xf32, #tpu.memory_space<vmem>> -> memref<1x32xf32, #tpu.memory_space<vmem>>
      %224 = tpu.memref_slice %arg12[%2] : memref<2x!tpu.dma_semaphore, #tpu.memory_space<semaphore_mem>> -> memref<1x!tpu.dma_semaphore, #tpu.memory_space<semaphore_mem>>
      %225 = tpu.memref_squeeze %224 : memref<1x!tpu.dma_semaphore, #tpu.memory_space<semaphore_mem>> -> memref<!tpu.dma_semaphore, #tpu.memory_space<semaphore_mem>>
      tpu.enqueue_dma source(%222 : memref<1x32xf32, #tpu.memory_space<any>>) target(%223 : memref<1x32xf32, #tpu.memory_space<vmem>>) target_semaphore(%225 : memref<!tpu.dma_semaphore, #tpu.memory_space<semaphore_mem>>)
      %c11_i32_119 = arith.constant 11 : i32
      %226 = arith.addi %136, %c11_i32_119 : i32
      %227 = arith.index_cast %226 : i32 to index
      %228 = memref.load %arg2[%227] : memref<16xi32, #tpu.memory_space<smem>>
      %c11_i32_120 = arith.constant 11 : i32
      %229 = arith.addi %137, %c11_i32_120 : i32
      %c0_i32_121 = arith.constant 0 : i32
      %230 = tpu.memref_slice %arg3[%228, %c0_i32_121] : memref<32x32xf32, #tpu.memory_space<any>> -> memref<1x32xf32, #tpu.memory_space<any>>
      %c0_i32_122 = arith.constant 0 : i32
      %231 = tpu.memref_slice %arg11[%229, %c0_i32_122] : memref<32x32xf32, #tpu.memory_space<vmem>> -> memref<1x32xf32, #tpu.memory_space<vmem>>
      %232 = tpu.memref_slice %arg12[%2] : memref<2x!tpu.dma_semaphore, #tpu.memory_space<semaphore_mem>> -> memref<1x!tpu.dma_semaphore, #tpu.memory_space<semaphore_mem>>
      %233 = tpu.memref_squeeze %232 : memref<1x!tpu.dma_semaphore, #tpu.memory_space<semaphore_mem>> -> memref<!tpu.dma_semaphore, #tpu.memory_space<semaphore_mem>>
      tpu.enqueue_dma source(%230 : memref<1x32xf32, #tpu.memory_space<any>>) target(%231 : memref<1x32xf32, #tpu.memory_space<vmem>>) target_semaphore(%233 : memref<!tpu.dma_semaphore, #tpu.memory_space<semaphore_mem>>)
      %c12_i32_123 = arith.constant 12 : i32
      %234 = arith.addi %136, %c12_i32_123 : i32
      %235 = arith.index_cast %234 : i32 to index
      %236 = memref.load %arg2[%235] : memref<16xi32, #tpu.memory_space<smem>>
      %c12_i32_124 = arith.constant 12 : i32
      %237 = arith.addi %137, %c12_i32_124 : i32
      %c0_i32_125 = arith.constant 0 : i32
      %238 = tpu.memref_slice %arg3[%236, %c0_i32_125] : memref<32x32xf32, #tpu.memory_space<any>> -> memref<1x32xf32, #tpu.memory_space<any>>
      %c0_i32_126 = arith.constant 0 : i32
      %239 = tpu.memref_slice %arg11[%237, %c0_i32_126] : memref<32x32xf32, #tpu.memory_space<vmem>> -> memref<1x32xf32, #tpu.memory_space<vmem>>
      %240 = tpu.memref_slice %arg12[%2] : memref<2x!tpu.dma_semaphore, #tpu.memory_space<semaphore_mem>> -> memref<1x!tpu.dma_semaphore, #tpu.memory_space<semaphore_mem>>
      %241 = tpu.memref_squeeze %240 : memref<1x!tpu.dma_semaphore, #tpu.memory_space<semaphore_mem>> -> memref<!tpu.dma_semaphore, #tpu.memory_space<semaphore_mem>>
      tpu.enqueue_dma source(%238 : memref<1x32xf32, #tpu.memory_space<any>>) target(%239 : memref<1x32xf32, #tpu.memory_space<vmem>>) target_semaphore(%241 : memref<!tpu.dma_semaphore, #tpu.memory_space<semaphore_mem>>)
      %c13_i32_127 = arith.constant 13 : i32
      %242 = arith.addi %136, %c13_i32_127 : i32
      %243 = arith.index_cast %242 : i32 to index
      %244 = memref.load %arg2[%243] : memref<16xi32, #tpu.memory_space<smem>>
      %c13_i32_128 = arith.constant 13 : i32
      %245 = arith.addi %137, %c13_i32_128 : i32
      %c0_i32_129 = arith.constant 0 : i32
      %246 = tpu.memref_slice %arg3[%244, %c0_i32_129] : memref<32x32xf32, #tpu.memory_space<any>> -> memref<1x32xf32, #tpu.memory_space<any>>
      %c0_i32_130 = arith.constant 0 : i32
      %247 = tpu.memref_slice %arg11[%245, %c0_i32_130] : memref<32x32xf32, #tpu.memory_space<vmem>> -> memref<1x32xf32, #tpu.memory_space<vmem>>
      %248 = tpu.memref_slice %arg12[%2] : memref<2x!tpu.dma_semaphore, #tpu.memory_space<semaphore_mem>> -> memref<1x!tpu.dma_semaphore, #tpu.memory_space<semaphore_mem>>
      %249 = tpu.memref_squeeze %248 : memref<1x!tpu.dma_semaphore, #tpu.memory_space<semaphore_mem>> -> memref<!tpu.dma_semaphore, #tpu.memory_space<semaphore_mem>>
      tpu.enqueue_dma source(%246 : memref<1x32xf32, #tpu.memory_space<any>>) target(%247 : memref<1x32xf32, #tpu.memory_space<vmem>>) target_semaphore(%249 : memref<!tpu.dma_semaphore, #tpu.memory_space<semaphore_mem>>)
      %c14_i32_131 = arith.constant 14 : i32
      %250 = arith.addi %136, %c14_i32_131 : i32
      %251 = arith.index_cast %250 : i32 to index
      %252 = memref.load %arg2[%251] : memref<16xi32, #tpu.memory_space<smem>>
      %c14_i32_132 = arith.constant 14 : i32
      %253 = arith.addi %137, %c14_i32_132 : i32
      %c0_i32_133 = arith.constant 0 : i32
      %254 = tpu.memref_slice %arg3[%252, %c0_i32_133] : memref<32x32xf32, #tpu.memory_space<any>> -> memref<1x32xf32, #tpu.memory_space<any>>
      %c0_i32_134 = arith.constant 0 : i32
      %255 = tpu.memref_slice %arg11[%253, %c0_i32_134] : memref<32x32xf32, #tpu.memory_space<vmem>> -> memref<1x32xf32, #tpu.memory_space<vmem>>
      %256 = tpu.memref_slice %arg12[%2] : memref<2x!tpu.dma_semaphore, #tpu.memory_space<semaphore_mem>> -> memref<1x!tpu.dma_semaphore, #tpu.memory_space<semaphore_mem>>
      %257 = tpu.memref_squeeze %256 : memref<1x!tpu.dma_semaphore, #tpu.memory_space<semaphore_mem>> -> memref<!tpu.dma_semaphore, #tpu.memory_space<semaphore_mem>>
      tpu.enqueue_dma source(%254 : memref<1x32xf32, #tpu.memory_space<any>>) target(%255 : memref<1x32xf32, #tpu.memory_space<vmem>>) target_semaphore(%257 : memref<!tpu.dma_semaphore, #tpu.memory_space<semaphore_mem>>)
      %c15_i32_135 = arith.constant 15 : i32
      %258 = arith.addi %136, %c15_i32_135 : i32
      %259 = arith.index_cast %258 : i32 to index
      %260 = memref.load %arg2[%259] : memref<16xi32, #tpu.memory_space<smem>>
      %c15_i32_136 = arith.constant 15 : i32
      %261 = arith.addi %137, %c15_i32_136 : i32
      %c0_i32_137 = arith.constant 0 : i32
      %262 = tpu.memref_slice %arg3[%260, %c0_i32_137] : memref<32x32xf32, #tpu.memory_space<any>> -> memref<1x32xf32, #tpu.memory_space<any>>
      %c0_i32_138 = arith.constant 0 : i32
      %263 = tpu.memref_slice %arg11[%261, %c0_i32_138] : memref<32x32xf32, #tpu.memory_space<vmem>> -> memref<1x32xf32, #tpu.memory_space<vmem>>
      %264 = tpu.memref_slice %arg12[%2] : memref<2x!tpu.dma_semaphore, #tpu.memory_space<semaphore_mem>> -> memref<1x!tpu.dma_semaphore, #tpu.memory_space<semaphore_mem>>
      %265 = tpu.memref_squeeze %264 : memref<1x!tpu.dma_semaphore, #tpu.memory_space<semaphore_mem>> -> memref<!tpu.dma_semaphore, #tpu.memory_space<semaphore_mem>>
      tpu.enqueue_dma source(%262 : memref<1x32xf32, #tpu.memory_space<any>>) target(%263 : memref<1x32xf32, #tpu.memory_space<vmem>>) target_semaphore(%265 : memref<!tpu.dma_semaphore, #tpu.memory_space<semaphore_mem>>)
    } else {
    }
    %6 = tpu.iota {dimensions = array<i32: 1>} : vector<16x32xi32>
    %c0 = arith.constant 0 : index
    %c0_2 = arith.constant 0 : index
    %7 = vector.load %arg5[%c0, %c0_2] : memref<16x1xi32, #tpu.memory_space<vmem>>, vector<16x1xi32>
    %8 = vector.broadcast %7 : vector<16x1xi32> to vector<16x32xi32>
    %9 = arith.cmpi eq, %6, %8 : vector<16x32xi32>
    %10 = arith.extui %9 : vector<16x32xi1> to vector<16x32xi32>
    %11 = arith.sitofp %10 : vector<16x32xi32> to vector<16x32xf32>
    %12 = tpu.iota {dimensions = array<i32: 1>} : vector<16x32xi32>
    %c0_3 = arith.constant 0 : index
    %c0_4 = arith.constant 0 : index
    %13 = vector.load %arg4[%c0_3, %c0_4] : memref<16x1xi32, #tpu.memory_space<vmem>>, vector<16x1xi32>
    %14 = vector.broadcast %13 : vector<16x1xi32> to vector<16x32xi32>
    %15 = arith.cmpi eq, %12, %14 : vector<16x32xi32>
    %16 = arith.extui %15 : vector<16x32xi1> to vector<16x32xi32>
    %17 = arith.sitofp %16 : vector<16x32xi32> to vector<16x32xf32>
    %c0_5 = arith.constant 0 : index
    %c0_6 = arith.constant 0 : index
    %18 = vector.load %arg6[%c0_5, %c0_6] : memref<32x32xf32, #tpu.memory_space<vmem>>, vector<32x32xf32>
    %cst = arith.constant dense<0.000000e+00> : vector<16x32xf32>
    %19 = tpu.matmul %11, %18, %cst {dimension_numbers = #tpu.dot_dimension_numbers<[1], [0], [0], [1], [0, 0, 1, 1], [], []>, precision = #tpu.contract_precision<fp32>} : vector<16x32xf32>, vector<32x32xf32>, vector<16x32xf32> -> vector<16x32xf32>
    %c0_7 = arith.constant 0 : index
    %c0_8 = arith.constant 0 : index
    %20 = vector.load %arg7[%c0_7, %c0_8] : memref<32x32xf32, #tpu.memory_space<vmem>>, vector<32x32xf32>
    %cst_9 = arith.constant dense<0.000000e+00> : vector<16x32xf32>
    %21 = tpu.matmul %17, %20, %cst_9 {dimension_numbers = #tpu.dot_dimension_numbers<[1], [0], [0], [1], [0, 0, 1, 1], [], []>, precision = #tpu.contract_precision<fp32>} : vector<16x32xf32>, vector<32x32xf32>, vector<16x32xf32> -> vector<16x32xf32>
    %22 = arith.addf %19, %21 : vector<16x32xf32>
    %c16_i32 = arith.constant 16 : i32
    %23 = arith.muli %2, %c16_i32 : i32
    %c0_i32_10 = arith.constant 0 : i32
    %24 = arith.addi %23, %c0_i32_10 : i32
    %c0_i32_11 = arith.constant 0 : i32
    %c0_i32_12 = arith.constant 0 : i32
    %25 = tpu.memref_slice %arg3[%c0_i32_11, %c0_i32_12] : memref<32x32xf32, #tpu.memory_space<any>> -> memref<1x32xf32, #tpu.memory_space<any>>
    %c0_i32_13 = arith.constant 0 : i32
    %26 = tpu.memref_slice %arg11[%24, %c0_i32_13] : memref<32x32xf32, #tpu.memory_space<vmem>> -> memref<1x32xf32, #tpu.memory_space<vmem>>
    %27 = tpu.memref_slice %arg12[%2] : memref<2x!tpu.dma_semaphore, #tpu.memory_space<semaphore_mem>> -> memref<1x!tpu.dma_semaphore, #tpu.memory_space<semaphore_mem>>
    %28 = tpu.memref_squeeze %27 : memref<1x!tpu.dma_semaphore, #tpu.memory_space<semaphore_mem>> -> memref<!tpu.dma_semaphore, #tpu.memory_space<semaphore_mem>>
    tpu.wait_dma2 semaphore(%28 : memref<!tpu.dma_semaphore, #tpu.memory_space<semaphore_mem>>) src(%25 : memref<1x32xf32, #tpu.memory_space<any>>) dst(%26 : memref<1x32xf32, #tpu.memory_space<vmem>>)
    %c1_i32_14 = arith.constant 1 : i32
    %29 = arith.addi %23, %c1_i32_14 : i32
    %c0_i32_15 = arith.constant 0 : i32
    %c0_i32_16 = arith.constant 0 : i32
    %30 = tpu.memref_slice %arg3[%c0_i32_15, %c0_i32_16] : memref<32x32xf32, #tpu.memory_space<any>> -> memref<1x32xf32, #tpu.memory_space<any>>
    %c0_i32_17 = arith.constant 0 : i32
    %31 = tpu.memref_slice %arg11[%29, %c0_i32_17] : memref<32x32xf32, #tpu.memory_space<vmem>> -> memref<1x32xf32, #tpu.memory_space<vmem>>
    %32 = tpu.memref_slice %arg12[%2] : memref<2x!tpu.dma_semaphore, #tpu.memory_space<semaphore_mem>> -> memref<1x!tpu.dma_semaphore, #tpu.memory_space<semaphore_mem>>
    %33 = tpu.memref_squeeze %32 : memref<1x!tpu.dma_semaphore, #tpu.memory_space<semaphore_mem>> -> memref<!tpu.dma_semaphore, #tpu.memory_space<semaphore_mem>>
    tpu.wait_dma2 semaphore(%33 : memref<!tpu.dma_semaphore, #tpu.memory_space<semaphore_mem>>) src(%30 : memref<1x32xf32, #tpu.memory_space<any>>) dst(%31 : memref<1x32xf32, #tpu.memory_space<vmem>>)
    %c2_i32 = arith.constant 2 : i32
    %34 = arith.addi %23, %c2_i32 : i32
    %c0_i32_18 = arith.constant 0 : i32
    %c0_i32_19 = arith.constant 0 : i32
    %35 = tpu.memref_slice %arg3[%c0_i32_18, %c0_i32_19] : memref<32x32xf32, #tpu.memory_space<any>> -> memref<1x32xf32, #tpu.memory_space<any>>
    %c0_i32_20 = arith.constant 0 : i32
    %36 = tpu.memref_slice %arg11[%34, %c0_i32_20] : memref<32x32xf32, #tpu.memory_space<vmem>> -> memref<1x32xf32, #tpu.memory_space<vmem>>
    %37 = tpu.memref_slice %arg12[%2] : memref<2x!tpu.dma_semaphore, #tpu.memory_space<semaphore_mem>> -> memref<1x!tpu.dma_semaphore, #tpu.memory_space<semaphore_mem>>
    %38 = tpu.memref_squeeze %37 : memref<1x!tpu.dma_semaphore, #tpu.memory_space<semaphore_mem>> -> memref<!tpu.dma_semaphore, #tpu.memory_space<semaphore_mem>>
    tpu.wait_dma2 semaphore(%38 : memref<!tpu.dma_semaphore, #tpu.memory_space<semaphore_mem>>) src(%35 : memref<1x32xf32, #tpu.memory_space<any>>) dst(%36 : memref<1x32xf32, #tpu.memory_space<vmem>>)
    %c3_i32 = arith.constant 3 : i32
    %39 = arith.addi %23, %c3_i32 : i32
    %c0_i32_21 = arith.constant 0 : i32
    %c0_i32_22 = arith.constant 0 : i32
    %40 = tpu.memref_slice %arg3[%c0_i32_21, %c0_i32_22] : memref<32x32xf32, #tpu.memory_space<any>> -> memref<1x32xf32, #tpu.memory_space<any>>
    %c0_i32_23 = arith.constant 0 : i32
    %41 = tpu.memref_slice %arg11[%39, %c0_i32_23] : memref<32x32xf32, #tpu.memory_space<vmem>> -> memref<1x32xf32, #tpu.memory_space<vmem>>
    %42 = tpu.memref_slice %arg12[%2] : memref<2x!tpu.dma_semaphore, #tpu.memory_space<semaphore_mem>> -> memref<1x!tpu.dma_semaphore, #tpu.memory_space<semaphore_mem>>
    %43 = tpu.memref_squeeze %42 : memref<1x!tpu.dma_semaphore, #tpu.memory_space<semaphore_mem>> -> memref<!tpu.dma_semaphore, #tpu.memory_space<semaphore_mem>>
    tpu.wait_dma2 semaphore(%43 : memref<!tpu.dma_semaphore, #tpu.memory_space<semaphore_mem>>) src(%40 : memref<1x32xf32, #tpu.memory_space<any>>) dst(%41 : memref<1x32xf32, #tpu.memory_space<vmem>>)
    %c4_i32 = arith.constant 4 : i32
    %44 = arith.addi %23, %c4_i32 : i32
    %c0_i32_24 = arith.constant 0 : i32
    %c0_i32_25 = arith.constant 0 : i32
    %45 = tpu.memref_slice %arg3[%c0_i32_24, %c0_i32_25] : memref<32x32xf32, #tpu.memory_space<any>> -> memref<1x32xf32, #tpu.memory_space<any>>
    %c0_i32_26 = arith.constant 0 : i32
    %46 = tpu.memref_slice %arg11[%44, %c0_i32_26] : memref<32x32xf32, #tpu.memory_space<vmem>> -> memref<1x32xf32, #tpu.memory_space<vmem>>
    %47 = tpu.memref_slice %arg12[%2] : memref<2x!tpu.dma_semaphore, #tpu.memory_space<semaphore_mem>> -> memref<1x!tpu.dma_semaphore, #tpu.memory_space<semaphore_mem>>
    %48 = tpu.memref_squeeze %47 : memref<1x!tpu.dma_semaphore, #tpu.memory_space<semaphore_mem>> -> memref<!tpu.dma_semaphore, #tpu.memory_space<semaphore_mem>>
    tpu.wait_dma2 semaphore(%48 : memref<!tpu.dma_semaphore, #tpu.memory_space<semaphore_mem>>) src(%45 : memref<1x32xf32, #tpu.memory_space<any>>) dst(%46 : memref<1x32xf32, #tpu.memory_space<vmem>>)
    %c5_i32 = arith.constant 5 : i32
    %49 = arith.addi %23, %c5_i32 : i32
    %c0_i32_27 = arith.constant 0 : i32
    %c0_i32_28 = arith.constant 0 : i32
    %50 = tpu.memref_slice %arg3[%c0_i32_27, %c0_i32_28] : memref<32x32xf32, #tpu.memory_space<any>> -> memref<1x32xf32, #tpu.memory_space<any>>
    %c0_i32_29 = arith.constant 0 : i32
    %51 = tpu.memref_slice %arg11[%49, %c0_i32_29] : memref<32x32xf32, #tpu.memory_space<vmem>> -> memref<1x32xf32, #tpu.memory_space<vmem>>
    %52 = tpu.memref_slice %arg12[%2] : memref<2x!tpu.dma_semaphore, #tpu.memory_space<semaphore_mem>> -> memref<1x!tpu.dma_semaphore, #tpu.memory_space<semaphore_mem>>
    %53 = tpu.memref_squeeze %52 : memref<1x!tpu.dma_semaphore, #tpu.memory_space<semaphore_mem>> -> memref<!tpu.dma_semaphore, #tpu.memory_space<semaphore_mem>>
    tpu.wait_dma2 semaphore(%53 : memref<!tpu.dma_semaphore, #tpu.memory_space<semaphore_mem>>) src(%50 : memref<1x32xf32, #tpu.memory_space<any>>) dst(%51 : memref<1x32xf32, #tpu.memory_space<vmem>>)
    %c6_i32 = arith.constant 6 : i32
    %54 = arith.addi %23, %c6_i32 : i32
    %c0_i32_30 = arith.constant 0 : i32
    %c0_i32_31 = arith.constant 0 : i32
    %55 = tpu.memref_slice %arg3[%c0_i32_30, %c0_i32_31] : memref<32x32xf32, #tpu.memory_space<any>> -> memref<1x32xf32, #tpu.memory_space<any>>
    %c0_i32_32 = arith.constant 0 : i32
    %56 = tpu.memref_slice %arg11[%54, %c0_i32_32] : memref<32x32xf32, #tpu.memory_space<vmem>> -> memref<1x32xf32, #tpu.memory_space<vmem>>
    %57 = tpu.memref_slice %arg12[%2] : memref<2x!tpu.dma_semaphore, #tpu.memory_space<semaphore_mem>> -> memref<1x!tpu.dma_semaphore, #tpu.memory_space<semaphore_mem>>
    %58 = tpu.memref_squeeze %57 : memref<1x!tpu.dma_semaphore, #tpu.memory_space<semaphore_mem>> -> memref<!tpu.dma_semaphore, #tpu.memory_space<semaphore_mem>>
    tpu.wait_dma2 semaphore(%58 : memref<!tpu.dma_semaphore, #tpu.memory_space<semaphore_mem>>) src(%55 : memref<1x32xf32, #tpu.memory_space<any>>) dst(%56 : memref<1x32xf32, #tpu.memory_space<vmem>>)
    %c7_i32 = arith.constant 7 : i32
    %59 = arith.addi %23, %c7_i32 : i32
    %c0_i32_33 = arith.constant 0 : i32
    %c0_i32_34 = arith.constant 0 : i32
    %60 = tpu.memref_slice %arg3[%c0_i32_33, %c0_i32_34] : memref<32x32xf32, #tpu.memory_space<any>> -> memref<1x32xf32, #tpu.memory_space<any>>
    %c0_i32_35 = arith.constant 0 : i32
    %61 = tpu.memref_slice %arg11[%59, %c0_i32_35] : memref<32x32xf32, #tpu.memory_space<vmem>> -> memref<1x32xf32, #tpu.memory_space<vmem>>
    %62 = tpu.memref_slice %arg12[%2] : memref<2x!tpu.dma_semaphore, #tpu.memory_space<semaphore_mem>> -> memref<1x!tpu.dma_semaphore, #tpu.memory_space<semaphore_mem>>
    %63 = tpu.memref_squeeze %62 : memref<1x!tpu.dma_semaphore, #tpu.memory_space<semaphore_mem>> -> memref<!tpu.dma_semaphore, #tpu.memory_space<semaphore_mem>>
    tpu.wait_dma2 semaphore(%63 : memref<!tpu.dma_semaphore, #tpu.memory_space<semaphore_mem>>) src(%60 : memref<1x32xf32, #tpu.memory_space<any>>) dst(%61 : memref<1x32xf32, #tpu.memory_space<vmem>>)
    %c8_i32 = arith.constant 8 : i32
    %64 = arith.addi %23, %c8_i32 : i32
    %c0_i32_36 = arith.constant 0 : i32
    %c0_i32_37 = arith.constant 0 : i32
    %65 = tpu.memref_slice %arg3[%c0_i32_36, %c0_i32_37] : memref<32x32xf32, #tpu.memory_space<any>> -> memref<1x32xf32, #tpu.memory_space<any>>
    %c0_i32_38 = arith.constant 0 : i32
    %66 = tpu.memref_slice %arg11[%64, %c0_i32_38] : memref<32x32xf32, #tpu.memory_space<vmem>> -> memref<1x32xf32, #tpu.memory_space<vmem>>
    %67 = tpu.memref_slice %arg12[%2] : memref<2x!tpu.dma_semaphore, #tpu.memory_space<semaphore_mem>> -> memref<1x!tpu.dma_semaphore, #tpu.memory_space<semaphore_mem>>
    %68 = tpu.memref_squeeze %67 : memref<1x!tpu.dma_semaphore, #tpu.memory_space<semaphore_mem>> -> memref<!tpu.dma_semaphore, #tpu.memory_space<semaphore_mem>>
    tpu.wait_dma2 semaphore(%68 : memref<!tpu.dma_semaphore, #tpu.memory_space<semaphore_mem>>) src(%65 : memref<1x32xf32, #tpu.memory_space<any>>) dst(%66 : memref<1x32xf32, #tpu.memory_space<vmem>>)
    %c9_i32 = arith.constant 9 : i32
    %69 = arith.addi %23, %c9_i32 : i32
    %c0_i32_39 = arith.constant 0 : i32
    %c0_i32_40 = arith.constant 0 : i32
    %70 = tpu.memref_slice %arg3[%c0_i32_39, %c0_i32_40] : memref<32x32xf32, #tpu.memory_space<any>> -> memref<1x32xf32, #tpu.memory_space<any>>
    %c0_i32_41 = arith.constant 0 : i32
    %71 = tpu.memref_slice %arg11[%69, %c0_i32_41] : memref<32x32xf32, #tpu.memory_space<vmem>> -> memref<1x32xf32, #tpu.memory_space<vmem>>
    %72 = tpu.memref_slice %arg12[%2] : memref<2x!tpu.dma_semaphore, #tpu.memory_space<semaphore_mem>> -> memref<1x!tpu.dma_semaphore, #tpu.memory_space<semaphore_mem>>
    %73 = tpu.memref_squeeze %72 : memref<1x!tpu.dma_semaphore, #tpu.memory_space<semaphore_mem>> -> memref<!tpu.dma_semaphore, #tpu.memory_space<semaphore_mem>>
    tpu.wait_dma2 semaphore(%73 : memref<!tpu.dma_semaphore, #tpu.memory_space<semaphore_mem>>) src(%70 : memref<1x32xf32, #tpu.memory_space<any>>) dst(%71 : memref<1x32xf32, #tpu.memory_space<vmem>>)
    %c10_i32 = arith.constant 10 : i32
    %74 = arith.addi %23, %c10_i32 : i32
    %c0_i32_42 = arith.constant 0 : i32
    %c0_i32_43 = arith.constant 0 : i32
    %75 = tpu.memref_slice %arg3[%c0_i32_42, %c0_i32_43] : memref<32x32xf32, #tpu.memory_space<any>> -> memref<1x32xf32, #tpu.memory_space<any>>
    %c0_i32_44 = arith.constant 0 : i32
    %76 = tpu.memref_slice %arg11[%74, %c0_i32_44] : memref<32x32xf32, #tpu.memory_space<vmem>> -> memref<1x32xf32, #tpu.memory_space<vmem>>
    %77 = tpu.memref_slice %arg12[%2] : memref<2x!tpu.dma_semaphore, #tpu.memory_space<semaphore_mem>> -> memref<1x!tpu.dma_semaphore, #tpu.memory_space<semaphore_mem>>
    %78 = tpu.memref_squeeze %77 : memref<1x!tpu.dma_semaphore, #tpu.memory_space<semaphore_mem>> -> memref<!tpu.dma_semaphore, #tpu.memory_space<semaphore_mem>>
    tpu.wait_dma2 semaphore(%78 : memref<!tpu.dma_semaphore, #tpu.memory_space<semaphore_mem>>) src(%75 : memref<1x32xf32, #tpu.memory_space<any>>) dst(%76 : memref<1x32xf32, #tpu.memory_space<vmem>>)
    %c11_i32 = arith.constant 11 : i32
    %79 = arith.addi %23, %c11_i32 : i32
    %c0_i32_45 = arith.constant 0 : i32
    %c0_i32_46 = arith.constant 0 : i32
    %80 = tpu.memref_slice %arg3[%c0_i32_45, %c0_i32_46] : memref<32x32xf32, #tpu.memory_space<any>> -> memref<1x32xf32, #tpu.memory_space<any>>
    %c0_i32_47 = arith.constant 0 : i32
    %81 = tpu.memref_slice %arg11[%79, %c0_i32_47] : memref<32x32xf32, #tpu.memory_space<vmem>> -> memref<1x32xf32, #tpu.memory_space<vmem>>
    %82 = tpu.memref_slice %arg12[%2] : memref<2x!tpu.dma_semaphore, #tpu.memory_space<semaphore_mem>> -> memref<1x!tpu.dma_semaphore, #tpu.memory_space<semaphore_mem>>
    %83 = tpu.memref_squeeze %82 : memref<1x!tpu.dma_semaphore, #tpu.memory_space<semaphore_mem>> -> memref<!tpu.dma_semaphore, #tpu.memory_space<semaphore_mem>>
    tpu.wait_dma2 semaphore(%83 : memref<!tpu.dma_semaphore, #tpu.memory_space<semaphore_mem>>) src(%80 : memref<1x32xf32, #tpu.memory_space<any>>) dst(%81 : memref<1x32xf32, #tpu.memory_space<vmem>>)
    %c12_i32 = arith.constant 12 : i32
    %84 = arith.addi %23, %c12_i32 : i32
    %c0_i32_48 = arith.constant 0 : i32
    %c0_i32_49 = arith.constant 0 : i32
    %85 = tpu.memref_slice %arg3[%c0_i32_48, %c0_i32_49] : memref<32x32xf32, #tpu.memory_space<any>> -> memref<1x32xf32, #tpu.memory_space<any>>
    %c0_i32_50 = arith.constant 0 : i32
    %86 = tpu.memref_slice %arg11[%84, %c0_i32_50] : memref<32x32xf32, #tpu.memory_space<vmem>> -> memref<1x32xf32, #tpu.memory_space<vmem>>
    %87 = tpu.memref_slice %arg12[%2] : memref<2x!tpu.dma_semaphore, #tpu.memory_space<semaphore_mem>> -> memref<1x!tpu.dma_semaphore, #tpu.memory_space<semaphore_mem>>
    %88 = tpu.memref_squeeze %87 : memref<1x!tpu.dma_semaphore, #tpu.memory_space<semaphore_mem>> -> memref<!tpu.dma_semaphore, #tpu.memory_space<semaphore_mem>>
    tpu.wait_dma2 semaphore(%88 : memref<!tpu.dma_semaphore, #tpu.memory_space<semaphore_mem>>) src(%85 : memref<1x32xf32, #tpu.memory_space<any>>) dst(%86 : memref<1x32xf32, #tpu.memory_space<vmem>>)
    %c13_i32 = arith.constant 13 : i32
    %89 = arith.addi %23, %c13_i32 : i32
    %c0_i32_51 = arith.constant 0 : i32
    %c0_i32_52 = arith.constant 0 : i32
    %90 = tpu.memref_slice %arg3[%c0_i32_51, %c0_i32_52] : memref<32x32xf32, #tpu.memory_space<any>> -> memref<1x32xf32, #tpu.memory_space<any>>
    %c0_i32_53 = arith.constant 0 : i32
    %91 = tpu.memref_slice %arg11[%89, %c0_i32_53] : memref<32x32xf32, #tpu.memory_space<vmem>> -> memref<1x32xf32, #tpu.memory_space<vmem>>
    %92 = tpu.memref_slice %arg12[%2] : memref<2x!tpu.dma_semaphore, #tpu.memory_space<semaphore_mem>> -> memref<1x!tpu.dma_semaphore, #tpu.memory_space<semaphore_mem>>
    %93 = tpu.memref_squeeze %92 : memref<1x!tpu.dma_semaphore, #tpu.memory_space<semaphore_mem>> -> memref<!tpu.dma_semaphore, #tpu.memory_space<semaphore_mem>>
    tpu.wait_dma2 semaphore(%93 : memref<!tpu.dma_semaphore, #tpu.memory_space<semaphore_mem>>) src(%90 : memref<1x32xf32, #tpu.memory_space<any>>) dst(%91 : memref<1x32xf32, #tpu.memory_space<vmem>>)
    %c14_i32 = arith.constant 14 : i32
    %94 = arith.addi %23, %c14_i32 : i32
    %c0_i32_54 = arith.constant 0 : i32
    %c0_i32_55 = arith.constant 0 : i32
    %95 = tpu.memref_slice %arg3[%c0_i32_54, %c0_i32_55] : memref<32x32xf32, #tpu.memory_space<any>> -> memref<1x32xf32, #tpu.memory_space<any>>
    %c0_i32_56 = arith.constant 0 : i32
    %96 = tpu.memref_slice %arg11[%94, %c0_i32_56] : memref<32x32xf32, #tpu.memory_space<vmem>> -> memref<1x32xf32, #tpu.memory_space<vmem>>
    %97 = tpu.memref_slice %arg12[%2] : memref<2x!tpu.dma_semaphore, #tpu.memory_space<semaphore_mem>> -> memref<1x!tpu.dma_semaphore, #tpu.memory_space<semaphore_mem>>
    %98 = tpu.memref_squeeze %97 : memref<1x!tpu.dma_semaphore, #tpu.memory_space<semaphore_mem>> -> memref<!tpu.dma_semaphore, #tpu.memory_space<semaphore_mem>>
    tpu.wait_dma2 semaphore(%98 : memref<!tpu.dma_semaphore, #tpu.memory_space<semaphore_mem>>) src(%95 : memref<1x32xf32, #tpu.memory_space<any>>) dst(%96 : memref<1x32xf32, #tpu.memory_space<vmem>>)
    %c15_i32 = arith.constant 15 : i32
    %99 = arith.addi %23, %c15_i32 : i32
    %c0_i32_57 = arith.constant 0 : i32
    %c0_i32_58 = arith.constant 0 : i32
    %100 = tpu.memref_slice %arg3[%c0_i32_57, %c0_i32_58] : memref<32x32xf32, #tpu.memory_space<any>> -> memref<1x32xf32, #tpu.memory_space<any>>
    %c0_i32_59 = arith.constant 0 : i32
    %101 = tpu.memref_slice %arg11[%99, %c0_i32_59] : memref<32x32xf32, #tpu.memory_space<vmem>> -> memref<1x32xf32, #tpu.memory_space<vmem>>
    %102 = tpu.memref_slice %arg12[%2] : memref<2x!tpu.dma_semaphore, #tpu.memory_space<semaphore_mem>> -> memref<1x!tpu.dma_semaphore, #tpu.memory_space<semaphore_mem>>
    %103 = tpu.memref_squeeze %102 : memref<1x!tpu.dma_semaphore, #tpu.memory_space<semaphore_mem>> -> memref<!tpu.dma_semaphore, #tpu.memory_space<semaphore_mem>>
    tpu.wait_dma2 semaphore(%103 : memref<!tpu.dma_semaphore, #tpu.memory_space<semaphore_mem>>) src(%100 : memref<1x32xf32, #tpu.memory_space<any>>) dst(%101 : memref<1x32xf32, #tpu.memory_space<vmem>>)
    %c16_i32_60 = arith.constant 16 : i32
    %104 = arith.muli %2, %c16_i32_60 : i32
    %105 = tpu.assume_multiple %104, 8 : i32
    %106 = arith.index_cast %105 : i32 to index
    %c0_61 = arith.constant 0 : index
    %107 = vector.load %arg11[%106, %c0_61] : memref<32x32xf32, #tpu.memory_space<vmem>>, vector<16x32xf32>
    %108 = arith.addf %107, %22 : vector<16x32xf32>
    %cst_62 = arith.constant dense<0.000000e+00> : vector<16xf32>
    %109 = vector.multi_reduction <add>, %108, %cst_62 [1] : vector<16x32xf32> to vector<16xf32>
    %110 = vector.shape_cast %109 : vector<16xf32> to vector<16x1xf32>
    %cst_63 = arith.constant 3.200000e+01 : f32
    %111 = vector.broadcast %cst_63 : f32 to vector<16x1xf32>
    %112 = arith.divf %110, %111 : vector<16x1xf32>
    %113 = vector.broadcast %112 : vector<16x1xf32> to vector<16x32xf32>
    %114 = arith.subf %108, %113 : vector<16x32xf32>
    %115 = arith.mulf %114, %114 : vector<16x32xf32>
    %cst_64 = arith.constant dense<0.000000e+00> : vector<16xf32>
    %116 = vector.multi_reduction <add>, %115, %cst_64 [1] : vector<16x32xf32> to vector<16xf32>
    %117 = vector.shape_cast %116 : vector<16xf32> to vector<16x1xf32>
    %cst_65 = arith.constant 3.200000e+01 : f32
    %118 = vector.broadcast %cst_65 : f32 to vector<16x1xf32>
    %119 = arith.divf %117, %118 : vector<16x1xf32>
    %cst_66 = arith.constant 9.99999996E-13 : f32
    %120 = vector.broadcast %cst_66 : f32 to vector<16x1xf32>
    %121 = arith.addf %119, %120 : vector<16x1xf32>
    %122 = math.rsqrt %121 : vector<16x1xf32>
    %123 = vector.broadcast %122 : vector<16x1xf32> to vector<16x32xf32>
    %124 = arith.mulf %114, %123 : vector<16x32xf32>
    %c0_67 = arith.constant 0 : index
    %c0_68 = arith.constant 0 : index
    %125 = vector.load %arg8[%c0_67, %c0_68] : memref<1x32xf32, #tpu.memory_space<vmem>>, vector<1x32xf32>
    %126 = vector.shape_cast %125 : vector<1x32xf32> to vector<32xf32>
    %127 = vector.shape_cast %126 : vector<32xf32> to vector<1x32xf32>
    %128 = vector.broadcast %127 : vector<1x32xf32> to vector<16x32xf32>
    %129 = arith.mulf %124, %128 : vector<16x32xf32>
    %c0_69 = arith.constant 0 : index
    %c0_70 = arith.constant 0 : index
    %130 = vector.load %arg9[%c0_69, %c0_70] : memref<1x32xf32, #tpu.memory_space<vmem>>, vector<1x32xf32>
    %131 = vector.shape_cast %130 : vector<1x32xf32> to vector<32xf32>
    %132 = vector.shape_cast %131 : vector<32xf32> to vector<1x32xf32>
    %133 = vector.broadcast %132 : vector<1x32xf32> to vector<16x32xf32>
    %134 = arith.addf %129, %133 : vector<16x32xf32>
    %c0_71 = arith.constant 0 : index
    %c0_72 = arith.constant 0 : index
    %135 = vector.load %arg10[%c0_71, %c0_72] : memref<16x32xf32, #tpu.memory_space<vmem>>, vector<16x32xf32>
    tpu.vector_store %arg10[%c0_71, %c0_72], %134 {strides = array<i32>} : memref<16x32xf32, #tpu.memory_space<vmem>>, vector<16x32xf32>,
    return
  }
  func.func @transform_1(%arg0: i32, %arg1: i32, %arg2: memref<16xi32, #tpu.memory_space<smem>>) -> (i32, i32) {
    %c1_i32 = arith.constant 1 : i32
    %0 = arith.muli %arg0, %c1_i32 : i32
    %1 = arith.addi %0, %arg1 : i32
    %c0_i32 = arith.constant 0 : i32
    %c0_i32_0 = arith.constant 0 : i32
    return %1, %c0_i32 : i32, i32
  }
  func.func @transform_2(%arg0: i32, %arg1: i32, %arg2: memref<16xi32, #tpu.memory_space<smem>>) -> (i32, i32) {
    %c1_i32 = arith.constant 1 : i32
    %0 = arith.muli %arg0, %c1_i32 : i32
    %1 = arith.addi %0, %arg1 : i32
    %c0_i32 = arith.constant 0 : i32
    %c0_i32_0 = arith.constant 0 : i32
    return %1, %c0_i32 : i32, i32
  }
  func.func @transform_3(%arg0: i32, %arg1: i32, %arg2: memref<16xi32, #tpu.memory_space<smem>>) -> (i32, i32) {
    %c0_i32 = arith.constant 0 : i32
    %c0_i32_0 = arith.constant 0 : i32
    %c0_i32_1 = arith.constant 0 : i32
    return %c0_i32, %c0_i32_0 : i32, i32
  }
  func.func @transform_4(%arg0: i32, %arg1: i32, %arg2: memref<16xi32, #tpu.memory_space<smem>>) -> (i32, i32) {
    %c0_i32 = arith.constant 0 : i32
    %c0_i32_0 = arith.constant 0 : i32
    %c0_i32_1 = arith.constant 0 : i32
    return %c0_i32, %c0_i32_0 : i32, i32
  }
  func.func @transform_5(%arg0: i32, %arg1: i32, %arg2: memref<16xi32, #tpu.memory_space<smem>>) -> (i32, i32) {
    %c0_i32 = arith.constant 0 : i32
    %c0_i32_0 = arith.constant 0 : i32
    %c0_i32_1 = arith.constant 0 : i32
    return %c0_i32, %c0_i32_0 : i32, i32
  }
  func.func @transform_6(%arg0: i32, %arg1: i32, %arg2: memref<16xi32, #tpu.memory_space<smem>>) -> (i32, i32) {
    %c0_i32 = arith.constant 0 : i32
    %c0_i32_0 = arith.constant 0 : i32
    %c0_i32_1 = arith.constant 0 : i32
    return %c0_i32, %c0_i32_0 : i32, i32
  }
  func.func @transform_7(%arg0: i32, %arg1: i32, %arg2: memref<16xi32, #tpu.memory_space<smem>>) -> (i32, i32) {
    %c1_i32 = arith.constant 1 : i32
    %0 = arith.muli %arg0, %c1_i32 : i32
    %1 = arith.addi %0, %arg1 : i32
    %c0_i32 = arith.constant 0 : i32
    %c0_i32_0 = arith.constant 0 : i32
    return %1, %c0_i32 : i32, i32
  }
}

</mosaic_0001>

<bundles_post_ra>
// kernel: tpu_custom_call.1
= control target key start
LH: loop header
LB: loop body
LE: loop exit
PB: predicated region body
PF: predicated region fallthrough
CT: control target
= control target key end

     0   :  { %s3268_s0 = inlined_call_operand.hbm [shape: s32[16], index: 0, kind: input, shape index: {}]   ;;  %s3269_s1 = inlined_call_operand.hbm [shape: f32[32,32], index: 1, kind: input, shape index: {}]   ;;  %s3270_s2 = inlined_call_operand.hbm [shape: s32[16,1], index: 2, kind: input, shape index: {}]   ;;  %s3271_s3 = inlined_call_operand.hbm [shape: s32[16,1], index: 3, kind: input, shape index: {}]   ;;  %s3272_s4 = inlined_call_operand.hbm [shape: f32[32,32], index: 4, kind: input, shape index: {}]   ;;  %s3273_s5 = inlined_call_operand.hbm [shape: f32[32,32], index: 5, kind: input, shape index: {}]   ;;  %s3274_s6 = inlined_call_operand.hbm [shape: f32[1,32], index: 6, kind: input, shape index: {}]   ;;  %s3275_s7 = inlined_call_operand.hbm [shape: f32[1,32], index: 7, kind: input, shape index: {}]   ;;  %s3276_s8 = inlined_call_operand.hbm [shape: f32[16,32], index: 8, kind: output, shape index: {}]  }
   0x1   :  { %s2122_s29 = scalar_lea.hbm %s3268_s0, 16 }
   0x2   :  { %p2123_p0 = scmp.ne.s32.totalorder %s3268_s0, %s2122_s29  ;;  %p2126_p1 = scmp.lt.u32.totalorder %s2122_s29, %s3268_s0 }
   0x4   :  { %p2128_p2 = pnand %p2126_p1, %p2123_p0 }
   0x6   :  { %2131 = shalt.err (!%p2128_p2)  }
   0x7   :  { %s2684_s12 = smov [#allocation5]  }
   0x8   :  { %14 = dma.hbm_to_smem %s3268_s0, 16, %s2684_s12, [#allocation4] }
   0x9   :  { %2670 = dma.done.wait [#allocation4], 16 }
   0xa   :  { %2671 = vsyncadd [#allocation4], 4294967280 }
   0xb   :  { %16 = sfence }
   0xc   :  { %17 = vsyncpa [#allocation7], 0 }
   0xd   :  { %18 = vsyncpa [#allocation10], 0 }
   0xe   :  { %19 = vsyncpa [#allocation13], 0 }
   0xf   :  { %20 = vsyncpa [#allocation16], 0 }
  0x10   :  { %21 = vsyncpa [#allocation8], 0  ;;  %s2685_s15 = smov [#allocation9]   ;;  %s2686_s17 = smov [#allocation12]  }
  0x11   :  { %s47_s16 = sshll.u32 %s2685_s15, 4  ;;  %s71_s18 = sshll.u32 %s2686_s17, 4  ;;  %s48_s16 = int_to_ptr.vmem [resolvable:$true] %s47_s16  ;;  %s2769_s18 = int_to_ptr.vmem [resolvable:$true] %s71_s18 }
  0x12   :  { %s2132_s21 = scalar_lea.hbm %s3271_s3, 256 }
  0x13   :  { %p2133_p3 = scmp.ne.s32.totalorder %s3271_s3, %s2132_s21  ;;  %p2136_p4 = scmp.lt.u32.totalorder %s2132_s21, %s3271_s3 }
  0x15   :  { %p2138_p5 = pnand %p2136_p4, %p2133_p3 }
  0x17   :  { %2141 = shalt.err (!%p2138_p5)
}
  0x18   :  { %s2142_s25 = scalar_lea.vmem %s48_s16, 256  ;;  %p2147_p7 = scmp.lt.s32.totalorder %s48_s16, %s48_s16 }
  0x19   :  { %p2143_p6 = scmp.ne.s32.totalorder %s48_s16, %s2142_s25  ;;  %p2148_p8 = scmp.lt.s32.totalorder %s2142_s25, %s2142_s25 }
  0x1b   :  { %p2149_p9 = por %p2148_p8, %p2147_p7 }
  0x1d   :  { %p2150_p10 = pnand %p2149_p9, %p2143_p6 }
  0x1f   :  { %2153 = shalt.err (!%p2150_p10)
}
  0x20   :  { %s2687_s26 = smov 128   ;;  %s2688_s27 = smov 8  }
  0x21   :  { %53 = dma.hbm_to_vmem [thread:$0]  %s3271_s3, 256, %s48_s16, [#allocation10], %s2687_s26, %s2687_s26, %s2688_s27  }
  0x22   :  { %s2154_s10 = scalar_lea.hbm %s3273_s5, 512 }
  0x23   :  { %p2155_p11 = scmp.ne.s32.totalorder %s3273_s5, %s2154_s10  ;;  %p2158_p12 = scmp.lt.u32.totalorder %s2154_s10, %s3273_s5 }
  0x25   :  { %p2160_p13 = pnand %p2158_p12, %p2155_p11 }
  0x27   :  { %2163 = shalt.err (!%p2160_p13)
}
  0x28   :  { %s2164_s15 = scalar_lea.vmem %s2769_s18, 512  ;;  %p2169_p1 = scmp.lt.s32.totalorder %s2769_s18, %s2769_s18 }
  0x29   :  { %p2165_p0 = scmp.ne.s32.totalorder %s2769_s18, %s2164_s15  ;;  %p2170_p2 = scmp.lt.s32.totalorder %s2164_s15, %s2164_s15 }
  0x2b   :  { %p2171_p3 = por %p2170_p2, %p2169_p1 }
  0x2d   :  { %p2172_p4 = pnand %p2171_p3, %p2165_p0 }
  0x2f   :  { %2175 = shalt.err (!%p2172_p4)
}
  0x30   :  { %77 = dma.hbm_to_vmem [thread:$0]  %s3273_s5, 512, %s2769_s18, [#allocation13], %s2687_s26, %s2687_s26, %s2688_s27  }
  0x31   :  { %s2689_s17 = smov [#allocation6]   ;;  %s2690_s20 = smov [#allocation11]  }
  0x32   :  { %s31_s19 = sshll.u32 %s2689_s17, 4  ;;  %s59_s21 = sshll.u32 %s2690_s20, 4  ;;  %s32_s19 = int_to_ptr.vmem [resolvable:$true] %s31_s19  ;;  %s2806_s21 = int_to_ptr.vmem [resolvable:$true] %s59_s21 }
  0x33   :  { %s2176_s23 = scalar_lea.hbm %s3270_s2, 256 }
  0x34   :  { %p2177_p5 = scmp.ne.s32.totalorder %s3270_s2, %s2176_s23  ;;  %p2180_p6 = scmp.lt.u32.totalorder %s2176_s23, %s3270_s2 }
  0x36   :  { %p2182_p7 = pnand %p2180_p6, %p2177_p5 }
  0x38   :  { %2185 = shalt.err (!%p2182_p7)
}
  0x39   :  { %s2186_s5 = scalar_lea.vmem %s32_s19, 256  ;;  %p2191_p9 = scmp.lt.s32.totalorder %s32_s19, %s32_s19 }
  0x3a   :  { %p2187_p8 = scmp.ne.s32.totalorder %s32_s19, %s2186_s5  ;;  %p2192_p10 = scmp.lt.s32.totalorder %s2186_s5, %s2186_s5 }
  0x3c   :  { %p2193_p11 = por %p2192_p10, %p2191_p9 }
  0x3e   :  { %p2194_p12 = pnand %p2193_p11, %p2187_p8 }
  0x40   :  { %2197 = shalt.err (!%p2194_p12)
}
  0x41   :  { %37 = dma.hbm_to_vmem [thread:$0]  %s3270_s2, 256, %s32_s19, [#allocation7], %s2687_s26, %s2687_s26, %s2688_s27  }
  0x42   :  { %s2198_s11 = scalar_lea.hbm %s3272_s4, 512 }
  0x43   :  { %p2199_p13 = scmp.ne.s32.totalorder %s3272_s4, %s2198_s11  ;;  %p2202_p0 = scmp.lt.u32.totalorder %s2198_s11, %s3272_s4 }
  0x45   :  { %p2204_p1 = pnand %p2202_p0, %p2199_p13 }
  0x47   :  { %2207 = shalt.err (!%p2204_p1)
}
  0x48   :  { %s2208_s3 = scalar_lea.vmem %s2806_s21, 512  ;;  %p2213_p3 = scmp.lt.s32.totalorder %s2806_s21, %s2806_s21 }
  0x49   :  { %p2209_p2 = scmp.ne.s32.totalorder %s2806_s21, %s2208_s3  ;;  %p2214_p4 = scmp.lt.s32.totalorder %s2208_s3, %s2208_s3 }
  0x4b   :  { %p2215_p5 = por %p2214_p4, %p2213_p3 }
  0x4d   :  { %p2216_p6 = pnand %p2215_p5, %p2209_p2 }
  0x4f   :  { %2219 = shalt.err (!%p2216_p6)
}
  0x50   :  { %65 = dma.hbm_to_vmem [thread:$0]  %s3272_s4, 512, %s2806_s21, [#allocation10], %s2687_s26, %s2687_s26, %s2688_s27  }
  0x51   :  { %s2691_s17 = smov [#allocation14]   ;;  %s2692_s20 = smov [#allocation15]  }
  0x52   :  { %s84_s19 = sshll.u32 %s2691_s17, 4  ;;  %s94_s0 = sshll.u32 %s2692_s20, 4  ;;  %s85_s19 = int_to_ptr.vmem [resolvable:$true] %s84_s19  ;;  %s95_s0 = int_to_ptr.vmem [resolvable:$true] %s94_s0 }
  0x53   :  { %s2220_s24 = scalar_lea.hbm %s3274_s6, 16 }
  0x54   :  { %p2221_p7 = scmp.ne.s32.totalorder %s3274_s6, %s2220_s24  ;;  %p2224_p8 = scmp.lt.u32.totalorder %s2220_s24, %s3274_s6 }
  0x56   :  { %p2226_p9 = pnand %p2224_p8, %p2221_p7 }
  0x58   :  { %2229 = shalt.err (!%p2226_p9)
}
  0x59   :  { %s2230_s4 = scalar_lea.vmem %s85_s19, 16  ;;  %s2234_s21 = scalar_lea.vmem %s85_s19, 32 }
  0x5a   :  { %p2231_p10 = scmp.ne.s32.totalorder %s85_s19, %s2230_s4  ;;  %p2235_p11 = scmp.lt.s32.totalorder %s85_s19, %s85_s19 }
  0x5b   :  { %p2236_p12 = scmp.lt.s32.totalorder %s2234_s21, %s2230_s4 }
  0x5d   :  { %p2237_p13 = por %p2236_p12, %p2235_p11 }
  0x5f   :  { %p2238_p0 = pnand %p2237_p13, %p2231_p10 }
  0x61   :  { %2241 = shalt.err (!%p2238_p0)
}
  0x62   :  { %87 = dma.hbm_to_vmem [thread:$0]  %s3274_s6, 16, %s85_s19, [#allocation13]  }
  0x63   :  { %s2242_s11 = scalar_lea.hbm %s3275_s7, 16 }
  0x64   :  { %p2243_p1 = scmp.ne.s32.totalorder %s3275_s7, %s2242_s11  ;;  %p2246_p2 = scmp.lt.u32.totalorder %s2242_s11, %s3275_s7 }
  0x66   :  { %p2248_p3 = pnand %p2246_p2, %p2243_p1 }
  0x68   :  { %2251 = shalt.err (!%p2248_p3)
}
  0x69   :  { %s2252_s3 = scalar_lea.vmem %s95_s0, 16  ;;  %s2256_s2 = scalar_lea.vmem %s95_s0, 32 }
  0x6a   :  { %p2253_p4 = scmp.ne.s32.totalorder %s95_s0, %s2252_s3  ;;  %p2257_p5 = scmp.lt.s32.totalorder %s95_s0, %s95_s0 }
  0x6b   :  { %p2258_p6 = scmp.lt.s32.totalorder %s2256_s2, %s2252_s3 }
  0x6d   :  { %p2259_p7 = por %p2258_p6, %p2257_p5 }
  0x6f   :  { %p2260_p8 = pnand %p2259_p7, %p2253_p4 }
  0x71   :  { %2263 = shalt.err (!%p2260_p8)
}
  0x72   :  { %97 = dma.hbm_to_vmem [thread:$0]  %s3275_s7, 16, %s95_s0, [#allocation16]  }
  0x73   :  { %2672 = dma.done.wait [#allocation7], 256  }
  0x74   :  { %2673 = vsyncadd [#allocation7], 4294967040 }
  0x75   :  { %2674 = dma.done.wait [#allocation10], 768  }
  0x76   :  { %2675 = vsyncadd [#allocation10], 4294966528 }
  0x77   :  { %2676 = dma.done.wait [#allocation13], 528  }
  0x78   :  { %2677 = vsyncadd [#allocation13], 4294966768 }
  0x79   :  { %2678 = dma.done.wait [#allocation16], 16  }
  0x7a   :  { %2679 = vsyncadd [#allocation16], 4294967280  ;;  %v2693_v0 = vmov 0   ;;  %v404_v1 = vld [vmem:[#allocation9 + $0x8] sm:$0xff]  ;;  %v403_v2 = vld [vmem:[#allocation9] sm:$0xff]  ;;  %s130_s7 = sld [smem:[#allocation5]] }
  0x7b   :  { %2117 = vset.pattern.permute.xlu1 %v2693_v0  ;;  %2116 = vset.pattern.permute.xlu0 %v2693_v0  ;;  %v431_v3 = vld [vmem:[#allocation11] sm:$0xff]  ;;  %v432_v4 = vld [vmem:[#allocation11 + $0x8] sm:$0xff]  ;;  %v433_v12 = vld [vmem:[#allocation11 + $0x10] sm:$0xff]  ;;  %s2694_s17 = smov [#allocation2]   ;;  %s2919_s20 = sld [smem:[#allocation5 + $0x1]] }
  0x7c   :  { %409 = vperm.xlu1 %2117, %v404_v1   ;;  %406 = vperm.xlu0 %2116, %v403_v2   ;;  %v418_v5 = vld [vmem:[#allocation6 + $0x8] sm:$0xff]  ;;  %v417_v6 = vld [vmem:[#allocation6] sm:$0xff]  ;;  %v981_v7 = vand.u32 4294901760, %v431_v3  ;;  %v984_v8 = vand.u32 4294901760, %v432_v4  ;;  %v434_v17 = vld [vmem:[#allocation11 + $0x18] sm:$0xff]  ;;  %v987_v18 = vand.u32 4294901760, %v433_v12 }
  0x7d   :  { %v435_v10 = vld [vmem:[#allocation12] sm:$0xff]  ;;  %v436_v11 = vld [vmem:[#allocation12 + $0x8] sm:$0xff]  ;;  %v990_v19 = vand.u32 4294901760, %v434_v17  ;;  %v437_v27 = vld [vmem:[#allocation12 + $0x10] sm:$0xff]  ;;  %s142_s19 = sshll.u32 %s2694_s17, 4  ;;  %s2695_s0 = smov [#allocation2 + $0x1]   ;;  %s2921_s19 = int_to_ptr.vmem [resolvable:$true] %s142_s19 }
  0x7e   :  { %v2867_v9 = vpack.c.bf16 %v984_v8, %v981_v7  ;;  %v2869_v13 = vsub.f32 %v431_v3, %v981_v7  ;;  %v2871_v14 = vsub.f32 %v432_v4, %v984_v8  ;;  %v447_v15 = vand.u32 4294901760, %v435_v10  ;;  %v438_v28 = vld [vmem:[#allocation12 + $0x18] sm:$0xff]  ;;  %s159_s22 = sshll.u32 %s2695_s0, 4  ;;  %s2923_s23 = sld [smem:[#allocation5 + $0x2]]  ;;  %s2925_s22 = int_to_ptr.vmem [resolvable:$true] %s159_s22 }
  0x7f   :  { %v450_v16 = vand.u32 4294901760, %v436_v11  ;;  %v1085_v25 = vsub.f32 %v433_v12, %v987_v18  ;;  %v2879_v26 = vpack.c.bf16 %v990_v19, %v987_v18  ;;  %v1092_v31 = vsub.f32 %v434_v17, %v990_v19  ;;  %s2696_s24 = smov [#allocation2 + $0x2]   ;;  %s2927_s28 = sld [smem:[#allocation5 + $0x3]] }
  0x80   :  { %423 = vperm.xlu1 %2117, %v418_v5   ;;  %420 = vperm.xlu0 %2116, %v417_v6   ;;  %v1072_v20 = vand.u32 4294901760, %v2869_v13  ;;  %v1079_v21 = vand.u32 4294901760, %v2871_v14  ;;  %v537_v23 = vsub.f32 %v435_v10, %v447_v15  ;;  %v453_v32 = vand.u32 4294901760, %v437_v27  ;;  %s176_s25 = sshll.u32 %s2696_s24, 4  ;;  %s1715_s29 = sshll.u32 %s130_s7, 4  ;;  %s2929_s25 = int_to_ptr.vmem [resolvable:$true] %s176_s25 }
  0x81   :  { %2019 = vmatprep.subr.bf16.mxu0 %v2867_v9  ;;  %v2877_v22 = vpack.c.bf16 %v450_v16, %v447_v15  ;;  %v544_v24 = vsub.f32 %v436_v11, %v450_v16  ;;  %v456_v33 = vand.u32 4294901760, %v438_v28  ;;  %v1086_v38 = vand.u32 4294901760, %v1085_v25  ;;  %s132_s21 = scalar_lea.hbm %s3269_s1, %s1715_s29  ;;  %s1717_s18 = sshll.u32 %s2919_s20, 4 }
  0x82   :  { %2021 = vmatpush3.bf16.msra.mxu0 %v2867_v9  ;;  %v1073_v29 = vsub.f32 %v2869_v13, %v1072_v20  ;;  %v1080_v30 = vsub.f32 %v2871_v14, %v1079_v21  ;;  %v538_v34 = vand.u32 4294901760, %v537_v23  ;;  %v1093_v39 = vand.u32 4294901760, %v1092_v31  ;;  %s2264_s30 = scalar_lea.hbm %s132_s21, 16  ;;  %s2938_s11 = scalar_lea.hbm %s3269_s1, 512 }
  0x83   :  { %1971 = vmatprep.subr.bf16.mxu1 %v2877_v22  ;;  %v545_v35 = vand.u32 4294901760, %v544_v24  ;;  %2023 = vmatprep.subr.bf16.mxu0 %v2879_v26  ;;  %v2887_v40 = vpack.c.bf16 %v456_v33, %v453_v32  ;;  %v1087_v44 = vsub.f32 %v1085_v25, %v1086_v38  ;;  %v551_v46 = vsub.f32 %v437_v27, %v453_v32  ;;  %p2265_p9 = scmp.ne.s32.totalorder %s132_s21, %s2264_s30  ;;  %p2267_p10 = scmp.lt.u32.totalorder %s132_s21, %s3269_s1 }
  0x84   :  { %1973 = vmatpush3.bf16.msra.mxu1 %v2877_v22  ;;  %v1074_v36 = vand.u32 4294901760, %v1073_v29  ;;  %v1081_v37 = vand.u32 4294901760, %v1080_v30  ;;  %v539_v41 = vsub.f32 %v537_v23, %v538_v34  ;;  %v1094_v45 = vsub.f32 %v1092_v31, %v1093_v39  ;;  %p2268_p11 = scmp.lt.u32.totalorder %s2938_s11, %s2264_s30  ;;  %p2270_p13 = scmp.lt.u32.totalorder %s2264_s30, %s132_s21 }
  0x85   :  { %v546_v42 = vsub.f32 %v544_v24, %v545_v35  ;;  %1975 = vmatprep.subr.bf16.mxu1 %v2887_v40  ;;  %v558_v49 = vsub.f32 %v438_v28, %v456_v33  ;;  %v1088_v50 = vand.u32 4294901760, %v1087_v44  ;;  %v552_v52 = vand.u32 4294901760, %v551_v46 }
  0x86   :  { %2025 = vmatpush3.bf16.msra.mxu0 %v2879_v26  ;;  %v2889_v43 = vpack.c.bf16 %v1081_v37, %v1074_v36  ;;  %v540_v47 = vand.u32 4294901760, %v539_v41  ;;  %v1095_v51 = vand.u32 4294901760, %v1094_v45  ;;  %v2901_v60 = vpack.c.bf16 %v2871_v14, %v2869_v13  ;;  %p2269_p12 = por %p2268_p11, %p2267_p10 }
  0x87   :  { %v547_v48 = vand.u32 4294901760, %v546_v42  ;;  %v559_v54 = vand.u32 4294901760, %v558_v49  ;;  %v553_v56 = vsub.f32 %v551_v46, %v552_v52  ;;  %v2905_v62 = vpack.c.bf16 %v544_v24, %v537_v23 }
  0x88   :  { %1977 = vmatpush3.bf16.msra.mxu1 %v2887_v40  ;;  %2027 = vmatprep.subr.bf16.mxu0 %v2889_v43  ;;  %v2896_v55 = vpack.c.bf16 %v1095_v51, %v1088_v50  ;;  %v2907_v63 = vpack.c.bf16 %v1092_v31, %v1085_v25  ;;  %v2909_v0 = vpack.c.bf16 %v558_v49, %v551_v46  ;;  %p2271_p0 = por %p2270_p13, %p2269_p12 }
  0x89   :  { %v2894_v53 = vpack.c.bf16 %v547_v48, %v540_v47  ;;  %v560_v57 = vsub.f32 %v558_v49, %v559_v54  ;;  %v554_v58 = vand.u32 4294901760, %v553_v56  ;;  %v2911_v1 = vpack.c.bf16 %v1079_v21, %v1072_v20 }
  0x8a   :  { %v2913_v2 = vpack.c.bf16 %v545_v35, %v538_v34  ;;  %v2915_v3 = vpack.c.bf16 %v1093_v39, %v1086_v38  ;;  %v2917_v4 = vpack.c.bf16 %v559_v54, %v552_v52  ;;  %p2272_p1 = pnand %p2271_p0, %p2265_p9 }
  0x8b   :  { %1979 = vmatprep.subr.bf16.mxu1 %v2894_v53  ;;  %v561_v59 = vand.u32 4294901760, %v560_v57 }
  0x8d   :  { %v2903_v61 = vpack.c.bf16 %v561_v59, %v554_v58 }
  0x8e   :  { %2275 = shalt.err (!%p2272_p1)  }
  0x8f   :  { %s2276_s14 = scalar_lea.vmem %s2921_s19, 16  ;;  %s2947_s15 = scalar_lea.vmem %s2921_s19, 512 }
  0x90   :  { %p2277_p2 = scmp.ne.s32.totalorder %s2921_s19, %s2276_s14  ;;  %p2281_p3 = scmp.lt.s32.totalorder %s2921_s19, %s2921_s19 }
  0x91   :  { %p2282_p4 = scmp.lt.s32.totalorder %s2947_s15, %s2276_s14 }
  0x93   :  { %p2283_p5 = por %p2282_p4, %p2281_p3 }
  0x95   :  { %p2284_p6 = pnand %p2283_p5, %p2277_p2 }
  0x97   :  { %2287 = shalt.err (!%p2284_p6)  }
  0x98   :  { %145 = dma.hbm_to_vmem [thread:$0]  %s132_s21, 16, %s2921_s19, [#allocation3] }
  0x99   :  { %s150_s6 = scalar_lea.hbm %s3269_s1, %s1717_s18  ;;  %s1719_s16 = sshll.u32 %s2923_s23, 4 }
  0x9a   :  { %s2288_s7 = scalar_lea.hbm %s150_s6, 16  ;;  %p2291_p8 = scmp.lt.u32.totalorder %s150_s6, %s3269_s1 }
  0x9b   :  { %p2289_p7 = scmp.ne.s32.totalorder %s150_s6, %s2288_s7  ;;  %p2292_p9 = scmp.lt.u32.totalorder %s2938_s11, %s2288_s7 }
  0x9c   :  { %p2294_p11 = scmp.lt.u32.totalorder %s2288_s7, %s150_s6 }
  0x9d   :  { %p2293_p10 = por %p2292_p9, %p2291_p8 }
  0x9f   :  { %p2295_p12 = por %p2294_p11, %p2293_p10 }
  0xa1   :  { %p2296_p13 = pnand %p2295_p12, %p2289_p7 }
  0xa3   :  { %2299 = shalt.err (!%p2296_p13)  }
  0xa4   :  { %s2300_s0 = scalar_lea.vmem %s2925_s22, 16  ;;  %p2305_p1 = scmp.lt.s32.totalorder %s2925_s22, %s2921_s19 }
  0xa5   :  { %p2301_p0 = scmp.ne.s32.totalorder %s2925_s22, %s2300_s0  ;;  %p2306_p2 = scmp.lt.s32.totalorder %s2947_s15, %s2300_s0 }
  0xa7   :  { %p2307_p3 = por %p2306_p2, %p2305_p1 }
  0xa9   :  { %p2308_p4 = pnand %p2307_p3, %p2301_p0 }
  0xab   :  { %2311 = shalt.err (!%p2308_p4)  }
  0xac   :  { %162 = dma.hbm_to_vmem [thread:$0]  %s150_s6, 16, %s2925_s22, [#allocation3] }
  0xad   :  { %s167_s29 = scalar_lea.hbm %s3269_s1, %s1719_s16  ;;  %s1721_s5 = sshll.u32 %s2927_s28, 4 }
  0xae   :  { %s2312_s4 = scalar_lea.hbm %s167_s29, 16  ;;  %p2315_p6 = scmp.lt.u32.totalorder %s167_s29, %s3269_s1 }
  0xaf   :  { %p2313_p5 = scmp.ne.s32.totalorder %s167_s29, %s2312_s4  ;;  %p2316_p7 = scmp.lt.u32.totalorder %s2938_s11, %s2312_s4 }
  0xb0   :  { %p2318_p9 = scmp.lt.u32.totalorder %s2312_s4, %s167_s29 }
  0xb1   :  { %p2317_p8 = por %p2316_p7, %p2315_p6 }
  0xb3   :  { %p2319_p10 = por %p2318_p9, %p2317_p8 }
  0xb5   :  { %p2320_p11 = pnand %p2319_p10, %p2313_p5 }
  0xb7   :  { %2323 = shalt.err (!%p2320_p11)  }
  0xb8   :  { %s2324_s22 = scalar_lea.vmem %s2929_s25, 16  ;;  %p2329_p13 = scmp.lt.s32.totalorder %s2929_s25, %s2921_s19 }
  0xb9   :  { %p2325_p12 = scmp.ne.s32.totalorder %s2929_s25, %s2324_s22  ;;  %p2330_p0 = scmp.lt.s32.totalorder %s2947_s15, %s2324_s22 }
  0xbb   :  { %p2331_p1 = por %p2330_p0, %p2329_p13 }
  0xbd   :  { %p2332_p2 = pnand %p2331_p1, %p2325_p12 }
  0xbf   :  { %2335 = shalt.err (!%p2332_p2)  }
  0xc0   :  { %179 = dma.hbm_to_vmem [thread:$0]  %s167_s29, 16, %s2929_s25, [#allocation3] }
  0xc1   :  { %s184_s9 = scalar_lea.hbm %s3269_s1, %s1721_s5  ;;  %s2697_s10 = smov [#allocation2 + $0x3]  }
  0xc2   :  { %s193_s12 = sshll.u32 %s2697_s10, 4  ;;  %s2984_s13 = sld [smem:[#allocation5 + $0x4]]  ;;  %s194_s12 = int_to_ptr.vmem [resolvable:$true] %s193_s12 }
  0xc3   :  { %s2336_s14 = scalar_lea.hbm %s184_s9, 16  ;;  %p2339_p4 = scmp.lt.u32.totalorder %s184_s9, %s3269_s1 }
  0xc4   :  { %p2337_p3 = scmp.ne.s32.totalorder %s184_s9, %s2336_s14  ;;  %p2340_p5 = scmp.lt.u32.totalorder %s2938_s11, %s2336_s14 }
  0xc5   :  { %p2342_p7 = scmp.lt.u32.totalorder %s2336_s14, %s184_s9 }
  0xc6   :  { %p2341_p6 = por %p2340_p5, %p2339_p4 }
  0xc8   :  { %p2343_p8 = por %p2342_p7, %p2341_p6 }
  0xca   :  { %p2344_p9 = pnand %p2343_p8, %p2337_p3 }
  0xcc   :  { %2347 = shalt.err (!%p2344_p9)  }
  0xcd   :  { %s2348_s25 = scalar_lea.vmem %s194_s12, 16  ;;  %p2353_p11 = scmp.lt.s32.totalorder %s194_s12, %s2921_s19 }
  0xce   :  { %p2349_p10 = scmp.ne.s32.totalorder %s194_s12, %s2348_s25  ;;  %p2354_p12 = scmp.lt.s32.totalorder %s2947_s15, %s2348_s25 }
  0xd0   :  { %p2355_p13 = por %p2354_p12, %p2353_p11 }
  0xd2   :  { %p2356_p0 = pnand %p2355_p13, %p2349_p10 }
  0xd4   :  { %2359 = shalt.err (!%p2356_p0)  }
  0xd5   :  { %196 = dma.hbm_to_vmem [thread:$0]  %s184_s9, 16, %s194_s12, [#allocation3] }
  0xd6   :  { %s2698_s6 = smov [#allocation2 + $0x4]   ;;  %s2992_s7 = sld [smem:[#allocation5 + $0x5]] }
  0xd7   :  { %s210_s16 = sshll.u32 %s2698_s6, 4  ;;  %s2699_s17 = smov [#allocation2 + $0x5]   ;;  %s211_s16 = int_to_ptr.vmem [resolvable:$true] %s210_s16 }
  0xd8   :  { %s227_s20 = sshll.u32 %s2699_s17, 4  ;;  %s2994_s0 = sld [smem:[#allocation5 + $0x6]]  ;;  %s2997_s20 = int_to_ptr.vmem [resolvable:$true] %s227_s20 }
  0xd9   :  { %s1723_s23 = sshll.u32 %s2984_s13, 4 }
  0xda   :  { %s201_s5 = scalar_lea.hbm %s3269_s1, %s1723_s23 }
  0xdb   :  { %s2360_s4 = scalar_lea.hbm %s201_s5, 16  ;;  %p2363_p2 = scmp.lt.u32.totalorder %s201_s5, %s3269_s1 }
  0xdc   :  { %p2361_p1 = scmp.ne.s32.totalorder %s201_s5, %s2360_s4  ;;  %p2364_p3 = scmp.lt.u32.totalorder %s2938_s11, %s2360_s4 }
  0xdd   :  { %p2366_p5 = scmp.lt.u32.totalorder %s2360_s4, %s201_s5 }
  0xde   :  { %p2365_p4 = por %p2364_p3, %p2363_p2 }
  0xe0   :  { %p2367_p6 = por %p2366_p5, %p2365_p4 }
  0xe2   :  { %p2368_p7 = pnand %p2367_p6, %p2361_p1 }
  0xe4   :  { %2371 = shalt.err (!%p2368_p7)  }
  0xe5   :  { %s2372_s22 = scalar_lea.vmem %s211_s16, 16  ;;  %p2377_p9 = scmp.lt.s32.totalorder %s211_s16, %s2921_s19 }
  0xe6   :  { %p2373_p8 = scmp.ne.s32.totalorder %s211_s16, %s2372_s22  ;;  %p2378_p10 = scmp.lt.s32.totalorder %s2947_s15, %s2372_s22 }
  0xe8   :  { %p2379_p11 = por %p2378_p10, %p2377_p9 }
  0xea   :  { %p2380_p12 = pnand %p2379_p11, %p2373_p8 }
  0xec   :  { %2383 = shalt.err (!%p2380_p12)  }
  0xed   :  { %213 = dma.hbm_to_vmem [thread:$0]  %s201_s5, 16, %s211_s16, [#allocation3] }
  0xee   :  { %s1725_s28 = sshll.u32 %s2992_s7, 4  ;;  %s2700_s30 = smov [#allocation2 + $0x6]  }
  0xef   :  { %s244_s9 = sshll.u32 %s2700_s30, 4  ;;  %s218_s13 = scalar_lea.hbm %s3269_s1, %s1725_s28  ;;  %s3012_s9 = int_to_ptr.vmem [resolvable:$true] %s244_s9 }
  0xf0   :  { %s2384_s14 = scalar_lea.hbm %s218_s13, 16  ;;  %p2387_p0 = scmp.lt.u32.totalorder %s218_s13, %s3269_s1 }
  0xf1   :  { %p2385_p13 = scmp.ne.s32.totalorder %s218_s13, %s2384_s14  ;;  %p2388_p1 = scmp.lt.u32.totalorder %s2938_s11, %s2384_s14 }
  0xf2   :  { %p2390_p3 = scmp.lt.u32.totalorder %s2384_s14, %s218_s13 }
  0xf3   :  { %p2389_p2 = por %p2388_p1, %p2387_p0 }
  0xf5   :  { %p2391_p4 = por %p2390_p3, %p2389_p2 }
  0xf7   :  { %p2392_p5 = pnand %p2391_p4, %p2385_p13 }
  0xf9   :  { %2395 = shalt.err (!%p2392_p5)  }
  0xfa   :  { %s2396_s25 = scalar_lea.vmem %s2997_s20, 16  ;;  %p2401_p7 = scmp.lt.s32.totalorder %s2997_s20, %s2921_s19 }
  0xfb   :  { %p2397_p6 = scmp.ne.s32.totalorder %s2997_s20, %s2396_s25  ;;  %p2402_p8 = scmp.lt.s32.totalorder %s2947_s15, %s2396_s25 }
  0xfd   :  { %p2403_p9 = por %p2402_p8, %p2401_p7 }
  0xff   :  { %p2404_p10 = pnand %p2403_p9, %p2397_p6 }
 0x101   :  { %2407 = shalt.err (!%p2404_p10)  }
 0x102   :  { %230 = dma.hbm_to_vmem [thread:$0]  %s218_s13, 16, %s2997_s20, [#allocation3] }
 0x103   :  { %s1727_s6 = sshll.u32 %s2994_s0, 4  ;;  %s3025_s16 = sld [smem:[#allocation5 + $0x7]] }
 0x104   :  { %s235_s23 = scalar_lea.hbm %s3269_s1, %s1727_s6 }
 0x105   :  { %s2408_s24 = scalar_lea.hbm %s235_s23, 16  ;;  %p2411_p12 = scmp.lt.u32.totalorder %s235_s23, %s3269_s1 }
 0x106   :  { %p2409_p11 = scmp.ne.s32.totalorder %s235_s23, %s2408_s24  ;;  %p2412_p13 = scmp.lt.u32.totalorder %s2938_s11, %s2408_s24 }
 0x107   :  { %p2414_p1 = scmp.lt.u32.totalorder %s2408_s24, %s235_s23 }
 0x108   :  { %p2413_p0 = por %p2412_p13, %p2411_p12 }
 0x10a   :  { %p2415_p2 = por %p2414_p1, %p2413_p0 }
 0x10c   :  { %p2416_p3 = pnand %p2415_p2, %p2409_p11 }
 0x10e   :  { %2419 = shalt.err (!%p2416_p3)  }
 0x10f   :  { %s2420_s20 = scalar_lea.vmem %s3012_s9, 16  ;;  %p2425_p5 = scmp.lt.s32.totalorder %s3012_s9, %s2921_s19 }
 0x110   :  { %p2421_p4 = scmp.ne.s32.totalorder %s3012_s9, %s2420_s20  ;;  %p2426_p6 = scmp.lt.s32.totalorder %s2947_s15, %s2420_s20 }
 0x112   :  { %p2427_p7 = por %p2426_p6, %p2425_p5 }
 0x114   :  { %p2428_p8 = pnand %p2427_p7, %p2421_p4 }
 0x116   :  { %2431 = shalt.err (!%p2428_p8)  }
 0x117   :  { %247 = dma.hbm_to_vmem [thread:$0]  %s235_s23, 16, %s3012_s9, [#allocation3] }
 0x118   :  { %s2701_s0 = smov [#allocation2 + $0x7]   ;;  %s3040_s21 = sld [smem:[#allocation5 + $0x8]] }
 0x119   :  { %s261_s4 = sshll.u32 %s2701_s0, 4  ;;  %s2702_s18 = smov [#allocation2 + $0x8]   ;;  %s262_s4 = int_to_ptr.vmem [resolvable:$true] %s261_s4 }
 0x11a   :  { %s278_s22 = sshll.u32 %s2702_s18, 4  ;;  %s3042_s28 = sld [smem:[#allocation5 + $0x9]]  ;;  %s3045_s22 = int_to_ptr.vmem [resolvable:$true] %s278_s22 }
 0x11b   :  { %s1729_s30 = sshll.u32 %s3025_s16, 4 }
 0x11c   :  { %s252_s13 = scalar_lea.hbm %s3269_s1, %s1729_s30 }
 0x11d   :  { %s2432_s14 = scalar_lea.hbm %s252_s13, 16  ;;  %p2435_p10 = scmp.lt.u32.totalorder %s252_s13, %s3269_s1 }
 0x11e   :  { %p2433_p9 = scmp.ne.s32.totalorder %s252_s13, %s2432_s14  ;;  %p2436_p11 = scmp.lt.u32.totalorder %s2938_s11, %s2432_s14 }
 0x11f   :  { %p2438_p13 = scmp.lt.u32.totalorder %s2432_s14, %s252_s13 }
 0x120   :  { %p2437_p12 = por %p2436_p11, %p2435_p10 }
 0x122   :  { %p2439_p0 = por %p2438_p13, %p2437_p12 }
 0x124   :  { %p2440_p1 = pnand %p2439_p0, %p2433_p9 }
 0x126   :  { %2443 = shalt.err (!%p2440_p1)  }
 0x127   :  { %s2444_s2 = scalar_lea.vmem %s262_s4, 16  ;;  %p2449_p3 = scmp.lt.s32.totalorder %s262_s4, %s2921_s19 }
 0x128   :  { %p2445_p2 = scmp.ne.s32.totalorder %s262_s4, %s2444_s2  ;;  %p2450_p4 = scmp.lt.s32.totalorder %s2947_s15, %s2444_s2 }
 0x12a   :  { %p2451_p5 = por %p2450_p4, %p2449_p3 }
 0x12c   :  { %p2452_p6 = pnand %p2451_p5, %p2445_p2 }
 0x12e   :  { %2455 = shalt.err (!%p2452_p6)  }
 0x12f   :  { %264 = dma.hbm_to_vmem [thread:$0]  %s252_s13, 16, %s262_s4, [#allocation3] }
 0x130   :  { %s1731_s25 = sshll.u32 %s3040_s21, 4  ;;  %s2703_s6 = smov [#allocation2 + $0x9]  }
 0x131   :  { %s295_s16 = sshll.u32 %s2703_s6, 4  ;;  %s269_s23 = scalar_lea.hbm %s3269_s1, %s1731_s25  ;;  %s3060_s16 = int_to_ptr.vmem [resolvable:$true] %s295_s16 }
 0x132   :  { %s2456_s24 = scalar_lea.hbm %s269_s23, 16  ;;  %p2459_p8 = scmp.lt.u32.totalorder %s269_s23, %s3269_s1 }
 0x133   :  { %p2457_p7 = scmp.ne.s32.totalorder %s269_s23, %s2456_s24  ;;  %p2460_p9 = scmp.lt.u32.totalorder %s2938_s11, %s2456_s24 }
 0x134   :  { %p2462_p11 = scmp.lt.u32.totalorder %s2456_s24, %s269_s23 }
 0x135   :  { %p2461_p10 = por %p2460_p9, %p2459_p8 }
 0x137   :  { %p2463_p12 = por %p2462_p11, %p2461_p10 }
 0x139   :  { %p2464_p13 = pnand %p2463_p12, %p2457_p7 }
 0x13b   :  { %2467 = shalt.err (!%p2464_p13)  }
 0x13c   :  { %s2468_s20 = scalar_lea.vmem %s3045_s22, 16  ;;  %p2473_p1 = scmp.lt.s32.totalorder %s3045_s22, %s2921_s19 }
 0x13d   :  { %p2469_p0 = scmp.ne.s32.totalorder %s3045_s22, %s2468_s20  ;;  %p2474_p2 = scmp.lt.s32.totalorder %s2947_s15, %s2468_s20 }
 0x13f   :  { %p2475_p3 = por %p2474_p2, %p2473_p1 }
 0x141   :  { %p2476_p4 = pnand %p2475_p3, %p2469_p0 }
 0x143   :  { %2479 = shalt.err (!%p2476_p4)  }
 0x144   :  { %281 = dma.hbm_to_vmem [thread:$0]  %s269_s23, 16, %s3045_s22, [#allocation3] }
 0x145   :  { %s1733_s0 = sshll.u32 %s3042_s28, 4 }
 0x146   :  { %s286_s18 = scalar_lea.hbm %s3269_s1, %s1733_s0 }
 0x147   :  { %s2480_s30 = scalar_lea.hbm %s286_s18, 16  ;;  %p2483_p6 = scmp.lt.u32.totalorder %s286_s18, %s3269_s1 }
 0x148   :  { %p2481_p5 = scmp.ne.s32.totalorder %s286_s18, %s2480_s30  ;;  %p2484_p7 = scmp.lt.u32.totalorder %s2938_s11, %s2480_s30 }
 0x149   :  { %p2486_p9 = scmp.lt.u32.totalorder %s2480_s30, %s286_s18 }
 0x14a   :  { %p2485_p8 = por %p2484_p7, %p2483_p6 }
 0x14c   :  { %p2487_p10 = por %p2486_p9, %p2485_p8 }
 0x14e   :  { %p2488_p11 = pnand %p2487_p10, %p2481_p5 }
 0x150   :  { %2491 = shalt.err (!%p2488_p11)  }
 0x151   :  { %s2492_s22 = scalar_lea.vmem %s3060_s16, 16  ;;  %p2497_p13 = scmp.lt.s32.totalorder %s3060_s16, %s2921_s19 }
 0x152   :  { %p2493_p12 = scmp.ne.s32.totalorder %s3060_s16, %s2492_s22  ;;  %p2498_p0 = scmp.lt.s32.totalorder %s2947_s15, %s2492_s22 }
 0x154   :  { %p2499_p1 = por %p2498_p0, %p2497_p13 }
 0x156   :  { %p2500_p2 = pnand %p2499_p1, %p2493_p12 }
 0x158   :  { %2503 = shalt.err (!%p2500_p2)  }
 0x159   :  { %298 = dma.hbm_to_vmem [thread:$0]  %s286_s18, 16, %s3060_s16, [#allocation3]  ;;  %v401_v5 = vlaneseq  ;;  %vm439_vm0 = vcmask 261120   ;;  %v410_v7 = vpop.permute.xlu1 %409  ;;  %v407_v8 = vpop.permute.xlu0 %406  ;;  %v2704_v10 = vmov 0.0  }
 0x15a   :  { %s1734_s28 = sld [smem:[#allocation5 + $0xa]]  ;;  %s3164_s13 = sld [smem:[#allocation5 + $0xb]] }
 0x15b   :  { %v402_v6 = vand.u32 127, %v401_v5  ;;  %s3166_s14 = sld [smem:[#allocation5 + $0xc]]  ;;  %s3168_s3 = sld [smem:[#allocation5 + $0xd]] }
 0x15c   :  { %s3170_s9 = sld [smem:[#allocation5 + $0xe]]  ;;  %s3172_s2 = sld [smem:[#allocation5 + $0xf]] }
 0x15d   :  { %vm412_vm1 = vcmp.eq.s32.totalorder %v402_v6, %v410_v7  ;;  %vm411_vm2 = vcmp.eq.s32.totalorder %v402_v6, %v407_v8  ;;  %v424_v16 = vpop.permute.xlu1 %423  ;;  %v421_v17 = vpop.permute.xlu0 %420  ;;  %s2705_s6 = smov [#allocation2 + $0xa]  }
 0x15e   :  { %v3086_v11 = vsel %vm412_vm1, 1.0, %v2704_v10  ;;  %v3088_v12 = vsel %vm411_vm2, 1.0, %v2704_v10  ;;  %vm426_vm3 = vcmp.eq.s32.totalorder %v402_v6, %v424_v16  ;;  %vm425_vm4 = vcmp.eq.s32.totalorder %v402_v6, %v421_v17  ;;  %s312_s16 = sshll.u32 %s2705_s6, 4  ;;  %s313_s16 = int_to_ptr.vmem [resolvable:$true] %s312_s16 }
 0x15f   :  { %v978_v13 = vsel %vm439_vm0, %v3086_v11, 0  ;;  %v975_v14 = vsel %vm439_vm0, %v3088_v12, 0  ;;  %v3094_v19 = vsel %vm426_vm3, 1.0, %v2704_v10  ;;  %v3096_v20 = vsel %vm425_vm4, 1.0, %v2704_v10 }
 0x160   :  { %v1060_v15 = vsub.f32 %v978_v13, %v978_v13  ;;  %v1050_v18 = vsub.f32 %v975_v14, %v975_v14  ;;  %v444_v24 = vsel %vm439_vm0, %v3094_v19, 0  ;;  %v441_v25 = vsel %vm439_vm0, %v3096_v20, 0  ;;  %s1735_s25 = sshll.u32 %s1734_s28, 4 }
 0x161   :  { %v526_v27 = vsub.f32 %v444_v24, %v444_v24  ;;  %v516_v30 = vsub.f32 %v441_v25, %v441_v25  ;;  %s303_s23 = scalar_lea.hbm %s3269_s1, %s1735_s25 }
 0x162   :  { %v1051_v21 = vand.u32 4294901760, %v1050_v18  ;;  %v1061_v23 = vand.u32 4294901760, %v1060_v15  ;;  %s2504_s24 = scalar_lea.hbm %s303_s23, 16  ;;  %p2507_p4 = scmp.lt.u32.totalorder %s303_s23, %s3269_s1 }
 0x163   :  { %v517_v33 = vand.u32 4294901760, %v516_v30  ;;  %v527_v34 = vand.u32 4294901760, %v526_v27  ;;  %p2505_p3 = scmp.ne.s32.totalorder %s303_s23, %s2504_s24  ;;  %p2508_p5 = scmp.lt.u32.totalorder %s2938_s11, %s2504_s24 }
 0x164   :  { %v1052_v28 = vsub.f32 %v1050_v18, %v1051_v21  ;;  %v1062_v29 = vsub.f32 %v1060_v15, %v1061_v23  ;;  %p2510_p7 = scmp.lt.u32.totalorder %s2504_s24, %s303_s23 }
 0x165   :  { %v518_v35 = vsub.f32 %v516_v30, %v517_v33  ;;  %v528_v36 = vsub.f32 %v526_v27, %v527_v34  ;;  %p2509_p6 = por %p2508_p5, %p2507_p4 }
 0x166   :  { %v1053_v31 = vand.u32 4294901760, %v1052_v28  ;;  %v1063_v32 = vand.u32 4294901760, %v1062_v29 }
 0x167   :  { %v519_v37 = vand.u32 4294901760, %v518_v35  ;;  %v529_v38 = vand.u32 4294901760, %v528_v36  ;;  %p2511_p8 = por %p2510_p7, %p2509_p6 }
 0x168   :  { %1912 = vmatprep.mubr.f32.mxu0 %v1053_v31 }
 0x169   :  { %1913 = vmatmul.mubr.f32.vlgmr.msra.gmra.mrb[0].mxu0 %v1063_v32  ;;  %1846 = vmatprep.mubr.f32.mxu1 %v519_v37  ;;  %p2512_p9 = pnand %p2511_p8, %p2505_p3 }
 0x16a   :  { %2029 = vmatpush3.bf16.msra.mxu0 %v2889_v43  ;;  %1923 = vmatprep.mubr.msk.f32.mxu0 %vm439_vm0, %v3088_v12 }
 0x16b   :  { %2031 = vmatprep.subr.bf16.mxu0 %v2896_v55  ;;  %1847 = vmatmul.mubr.f32.vlgmr.msra.gmra.mrb[0].mxu1 %v529_v38 }
 0x16c   :  { %1981 = vmatpush3.bf16.msra.mxu1 %v2894_v53  ;;  %1857 = vmatprep.mubr.msk.f32.mxu1 %vm439_vm0, %v3096_v20 }
 0x16d   :  { %1983 = vmatprep.subr.bf16.mxu1 %v2903_v61 }
 0x16e   :  { %2033 = vmatpush3.bf16.msra.mxu0 %v2896_v55 }
 0x16f   :  { %2035 = vmatprep.subr.bf16.mxu0 %v2901_v60 }
 0x170   :  { %1985 = vmatpush3.bf16.msra.mxu1 %v2903_v61 }
 0x171   :  { %1924 = vmatmul.mubr.msk.f32.vlgmr.msra.gmra.mrb[0].mxu0 %vm439_vm0, %v3086_v11  ;;  %1987 = vmatprep.subr.bf16.mxu1 %v2905_v62 }
 0x172   :  { %2037 = vmatpush3.bf16.msra.mxu0 %v2901_v60  ;;  %1934 = vmatprep.mubr.f32.mxu0 %v1050_v18 }
 0x173   :  { %2039 = vmatprep.subr.bf16.mxu0 %v2907_v63  ;;  %1858 = vmatmul.mubr.msk.f32.vlgmr.msra.gmra.mrb[0].mxu1 %vm439_vm0, %v3094_v19 }
 0x174   :  { %1989 = vmatpush3.bf16.msra.mxu1 %v2905_v62  ;;  %1868 = vmatprep.mubr.f32.mxu1 %v516_v30 }
 0x175   :  { %1991 = vmatprep.subr.bf16.mxu1 %v2909_v0 }
 0x176   :  { %2041 = vmatpush3.bf16.msra.mxu0 %v2907_v63 }
 0x177   :  { %2043 = vmatprep.subr.bf16.mxu0 %v2867_v9 }
 0x178   :  { %1993 = vmatpush3.bf16.msra.mxu1 %v2909_v0 }
 0x179   :  { %1935 = vmatmul.mubr.f32.vlgmr.msra.gmra.mrb[0].mxu0 %v1060_v15  ;;  %1995 = vmatprep.subr.bf16.mxu1 %v2877_v22 }
 0x17a   :  { %2045 = vmatpush3.bf16.msra.mxu0 %v2867_v9  ;;  %1945 = vmatprep.mubr.f32.mxu0 %v1051_v21 }
 0x17b   :  { %2047 = vmatprep.subr.bf16.mxu0 %v2879_v26  ;;  %1869 = vmatmul.mubr.f32.vlgmr.msra.gmra.mrb[0].mxu1 %v526_v27 }
 0x17c   :  { %1997 = vmatpush3.bf16.msra.mxu1 %v2877_v22  ;;  %1879 = vmatprep.mubr.f32.mxu1 %v517_v33 }
 0x17d   :  { %1999 = vmatprep.subr.bf16.mxu1 %v2887_v40 }
 0x17e   :  { %2049 = vmatpush3.bf16.msra.mxu0 %v2879_v26 }
 0x17f   :  { %2051 = vmatprep.subr.bf16.mxu0 %v2911_v1 }
 0x180   :  { %2001 = vmatpush3.bf16.msra.mxu1 %v2887_v40 }
 0x181   :  { %1946 = vmatmul.mubr.f32.vlgmr.msra.gmra.mrb[0].mxu0 %v1061_v23  ;;  %2003 = vmatprep.subr.bf16.mxu1 %v2913_v2 }
 0x182   :  { %2053 = vmatpush3.bf16.msra.mxu0 %v2911_v1  ;;  %1956 = vmatprep.mubr.msk.f32.mxu0 %vm439_vm0, %v3088_v12 }
 0x183   :  { %2055 = vmatprep.subr.bf16.mxu0 %v2915_v3  ;;  %1880 = vmatmul.mubr.f32.vlgmr.msra.gmra.mrb[0].mxu1 %v527_v34 }
 0x184   :  { %2005 = vmatpush3.bf16.msra.mxu1 %v2913_v2  ;;  %1890 = vmatprep.mubr.msk.f32.mxu1 %vm439_vm0, %v3096_v20 }
 0x185   :  { %2007 = vmatprep.subr.bf16.mxu1 %v2917_v4 }
 0x186   :  { %2057 = vmatpush3.bf16.msra.mxu0 %v2915_v3 }
 0x187   :  { %2059 = vmatprep.subr.bf16.mxu0 %v2867_v9 }
 0x188   :  { %2009 = vmatpush3.bf16.msra.mxu1 %v2917_v4 }
 0x189   :  { %1957 = vmatmul.mubr.msk.f32.vlgmr.msra.gmra.mrb[0].mxu0 %vm439_vm0, %v3086_v11  ;;  %2011 = vmatprep.subr.bf16.mxu1 %v2877_v22 }
 0x18a   :  { %2061 = vmatpush3.bf16.msra.mxu0 %v2867_v9  ;;  %1967 = vmatprep.mubr.msk.f32.mxu0 %vm439_vm0, %v3088_v12 }
 0x18b   :  { %2063 = vmatprep.subr.bf16.mxu0 %v2879_v26  ;;  %1891 = vmatmul.mubr.msk.f32.vlgmr.msra.gmra.mrb[0].mxu1 %vm439_vm0, %v3094_v19 }
 0x18c   :  { %2013 = vmatpush3.bf16.msra.mxu1 %v2877_v22  ;;  %1901 = vmatprep.mubr.msk.f32.mxu1 %vm439_vm0, %v3096_v20 }
 0x18d   :  { %2015 = vmatprep.subr.bf16.mxu1 %v2887_v40 }
 0x18e   :  { %2065 = vmatpush3.bf16.msra.mxu0 %v2879_v26 }
 0x190   :  { %2017 = vmatpush3.bf16.msra.mxu1 %v2887_v40 }
 0x191   :  { %1968 = vmatmul.mubr.msk.f32.vlgmr.msra.gmra.mrb[0].mxu0 %vm439_vm0, %v3086_v11 }
 0x193   :  { %1902 = vmatmul.mubr.msk.f32.vlgmr.msra.gmra.mrb[0].mxu1 %vm439_vm0, %v3094_v19 }
 0x194   :  { %2515 = shalt.err (!%p2512_p9)  }
 0x195   :  { %s2516_s20 = scalar_lea.vmem %s313_s16, 16  ;;  %p2521_p11 = scmp.lt.s32.totalorder %s313_s16, %s2921_s19 }
 0x196   :  { %p2517_p10 = scmp.ne.s32.totalorder %s313_s16, %s2516_s20  ;;  %p2522_p12 = scmp.lt.s32.totalorder %s2947_s15, %s2516_s20 }
 0x198   :  { %p2523_p13 = por %p2522_p12, %p2521_p11 }
 0x19a   :  { %p2524_p0 = pnand %p2523_p13, %p2517_p10 }
 0x19c   :  { %2527 = shalt.err (!%p2524_p0)  }
 0x19d   :  { %315 = dma.hbm_to_vmem [thread:$0]  %s303_s23, 16, %s313_s16, [#allocation3] }
 0x19e   :  { %s1737_s0 = sshll.u32 %s3164_s13, 4  ;;  %s2706_s30 = smov [#allocation2 + $0xb]  }
 0x19f   :  { %s320_s18 = scalar_lea.hbm %s3269_s1, %s1737_s0  ;;  %s329_s10 = sshll.u32 %s2706_s30, 4  ;;  %s330_s10 = int_to_ptr.vmem [resolvable:$true] %s329_s10 }
 0x1a0   :  { %s1739_s12 = sshll.u32 %s3166_s14, 4  ;;  %s2528_s22 = scalar_lea.hbm %s320_s18, 16 }
 0x1a1   :  { %p2529_p1 = scmp.ne.s32.totalorder %s320_s18, %s2528_s22  ;;  %p2531_p2 = scmp.lt.u32.totalorder %s320_s18, %s3269_s1 }
 0x1a2   :  { %p2532_p3 = scmp.lt.u32.totalorder %s2938_s11, %s2528_s22  ;;  %p2534_p5 = scmp.lt.u32.totalorder %s2528_s22, %s320_s18 }
 0x1a4   :  { %p2533_p4 = por %p2532_p3, %p2531_p2 }
 0x1a6   :  { %p2535_p6 = por %p2534_p5, %p2533_p4 }
 0x1a8   :  { %p2536_p7 = pnand %p2535_p6, %p2529_p1 }
 0x1aa   :  { %2539 = shalt.err (!%p2536_p7)  }
 0x1ab   :  { %s2540_s13 = scalar_lea.vmem %s330_s10, 16  ;;  %p2545_p9 = scmp.lt.s32.totalorder %s330_s10, %s2921_s19 }
 0x1ac   :  { %p2541_p8 = scmp.ne.s32.totalorder %s330_s10, %s2540_s13  ;;  %p2546_p10 = scmp.lt.s32.totalorder %s2947_s15, %s2540_s13 }
 0x1ae   :  { %p2547_p11 = por %p2546_p10, %p2545_p9 }
 0x1b0   :  { %p2548_p12 = pnand %p2547_p11, %p2541_p8 }
 0x1b2   :  { %2551 = shalt.err (!%p2548_p12)  }
 0x1b3   :  { %332 = dma.hbm_to_vmem [thread:$0]  %s320_s18, 16, %s330_s10, [#allocation3] }
 0x1b4   :  { %s337_s16 = scalar_lea.hbm %s3269_s1, %s1739_s12  ;;  %s2707_s7 = smov [#allocation2 + $0xc]  }
 0x1b5   :  { %s346_s17 = sshll.u32 %s2707_s7, 4  ;;  %s1741_s23 = sshll.u32 %s3168_s3, 4  ;;  %s347_s17 = int_to_ptr.vmem [resolvable:$true] %s346_s17 }
 0x1b6   :  { %s3201_s5 = scalar_lea.hbm %s3269_s1, %s1741_s23  ;;  %s2552_s20 = scalar_lea.hbm %s337_s16, 16 }
 0x1b7   :  { %p2553_p13 = scmp.ne.s32.totalorder %s337_s16, %s2552_s20  ;;  %p2555_p0 = scmp.lt.u32.totalorder %s337_s16, %s3269_s1 }
 0x1b8   :  { %p2556_p1 = scmp.lt.u32.totalorder %s2938_s11, %s2552_s20  ;;  %p2558_p3 = scmp.lt.u32.totalorder %s2552_s20, %s337_s16 }
 0x1ba   :  { %p2557_p2 = por %p2556_p1, %p2555_p0 }
 0x1bc   :  { %p2559_p4 = por %p2558_p3, %p2557_p2 }
 0x1be   :  { %p2560_p5 = pnand %p2559_p4, %p2553_p13 }
 0x1c0   :  { %2563 = shalt.err (!%p2560_p5)  }
 0x1c1   :  { %s2564_s21 = scalar_lea.vmem %s347_s17, 16  ;;  %p2569_p7 = scmp.lt.s32.totalorder %s347_s17, %s2921_s19 }
 0x1c2   :  { %p2565_p6 = scmp.ne.s32.totalorder %s347_s17, %s2564_s21  ;;  %p2570_p8 = scmp.lt.s32.totalorder %s2947_s15, %s2564_s21 }
 0x1c4   :  { %p2571_p9 = por %p2570_p8, %p2569_p7 }
 0x1c6   :  { %p2572_p10 = pnand %p2571_p9, %p2565_p6 }
 0x1c8   :  { %2575 = shalt.err (!%p2572_p10)  }
 0x1c9   :  { %349 = dma.hbm_to_vmem [thread:$0]  %s337_s16, 16, %s347_s17, [#allocation3] }
 0x1ca   :  { %s1743_s3 = sshll.u32 %s3170_s9, 4  ;;  %s2708_s18 = smov [#allocation2 + $0xd]  }
 0x1cb   :  { %s363_s30 = sshll.u32 %s2708_s18, 4  ;;  %s3213_s22 = scalar_lea.hbm %s3269_s1, %s1743_s3  ;;  %s364_s30 = int_to_ptr.vmem [resolvable:$true] %s363_s30 }
 0x1cc   :  { %s2576_s28 = scalar_lea.hbm %s3201_s5, 16  ;;  %p2579_p12 = scmp.lt.u32.totalorder %s3201_s5, %s3269_s1 }
 0x1cd   :  { %p2577_p11 = scmp.ne.s32.totalorder %s3201_s5, %s2576_s28  ;;  %p2580_p13 = scmp.lt.u32.totalorder %s2938_s11, %s2576_s28 }
 0x1ce   :  { %p2582_p1 = scmp.lt.u32.totalorder %s2576_s28, %s3201_s5 }
 0x1cf   :  { %p2581_p0 = por %p2580_p13, %p2579_p12 }
 0x1d1   :  { %p2583_p2 = por %p2582_p1, %p2581_p0 }
 0x1d3   :  { %p2584_p3 = pnand %p2583_p2, %p2577_p11 }
 0x1d5   :  { %2587 = shalt.err (!%p2584_p3)  }
 0x1d6   :  { %s2588_s9 = scalar_lea.vmem %s364_s30, 16  ;;  %p2593_p5 = scmp.lt.s32.totalorder %s364_s30, %s2921_s19 }
 0x1d7   :  { %p2589_p4 = scmp.ne.s32.totalorder %s364_s30, %s2588_s9  ;;  %p2594_p6 = scmp.lt.s32.totalorder %s2947_s15, %s2588_s9 }
 0x1d9   :  { %p2595_p7 = por %p2594_p6, %p2593_p5 }
 0x1db   :  { %p2596_p8 = pnand %p2595_p7, %p2589_p4 }
 0x1dd   :  { %2599 = shalt.err (!%p2596_p8)  }
 0x1de   :  { %366 = dma.hbm_to_vmem [thread:$0]  %s3201_s5, 16, %s364_s30, [#allocation3] }
 0x1df   :  { %s2709_s14 = smov [#allocation2 + $0xe]   ;;  %s1745_s16 = sshll.u32 %s3172_s2, 4 }
 0x1e0   :  { %s380_s6 = sshll.u32 %s2709_s14, 4  ;;  %s2600_s7 = scalar_lea.hbm %s3213_s22, 16  ;;  %s381_s6 = int_to_ptr.vmem [resolvable:$true] %s380_s6 }
 0x1e1   :  { %p2601_p9 = scmp.ne.s32.totalorder %s3213_s22, %s2600_s7  ;;  %p2603_p10 = scmp.lt.u32.totalorder %s3213_s22, %s3269_s1 }
 0x1e2   :  { %p2604_p11 = scmp.lt.u32.totalorder %s2938_s11, %s2600_s7  ;;  %p2606_p13 = scmp.lt.u32.totalorder %s2600_s7, %s3213_s22 }
 0x1e4   :  { %p2605_p12 = por %p2604_p11, %p2603_p10 }
 0x1e6   :  { %p2607_p0 = por %p2606_p13, %p2605_p12 }
 0x1e8   :  { %p2608_p1 = pnand %p2607_p0, %p2601_p9 }
 0x1ea   :  { %2611 = shalt.err (!%p2608_p1)  }
 0x1eb   :  { %s2612_s24 = scalar_lea.vmem %s381_s6, 16  ;;  %p2617_p3 = scmp.lt.s32.totalorder %s381_s6, %s2921_s19 }
 0x1ec   :  { %p2613_p2 = scmp.ne.s32.totalorder %s381_s6, %s2612_s24  ;;  %p2618_p4 = scmp.lt.s32.totalorder %s2947_s15, %s2612_s24 }
 0x1ee   :  { %p2619_p5 = por %p2618_p4, %p2617_p3 }
 0x1f0   :  { %p2620_p6 = pnand %p2619_p5, %p2613_p2 }
 0x1f2   :  { %2623 = shalt.err (!%p2620_p6)  }
 0x1f3   :  { %383 = dma.hbm_to_vmem [thread:$0]  %s3213_s22, 16, %s381_s6, [#allocation3] }
 0x1f4   :  { %s388_s5 = scalar_lea.hbm %s3269_s1, %s1745_s16  ;;  %s2710_s20 = smov [#allocation2 + $0xf]  }
 0x1f5   :  { %s397_s0 = sshll.u32 %s2710_s20, 4  ;;  %s2624_s4 = scalar_lea.hbm %s388_s5, 16  ;;  %s398_s0 = int_to_ptr.vmem [resolvable:$true] %s397_s0 }
 0x1f6   :  { %p2625_p7 = scmp.ne.s32.totalorder %s388_s5, %s2624_s4  ;;  %p2627_p8 = scmp.lt.u32.totalorder %s388_s5, %s3269_s1 }
 0x1f7   :  { %p2628_p9 = scmp.lt.u32.totalorder %s2938_s11, %s2624_s4  ;;  %p2630_p11 = scmp.lt.u32.totalorder %s2624_s4, %s388_s5 }
 0x1f9   :  { %p2629_p10 = por %p2628_p9, %p2627_p8 }
 0x1fb   :  { %p2631_p12 = por %p2630_p11, %p2629_p10 }
 0x1fd   :  { %p2632_p13 = pnand %p2631_p12, %p2625_p7 }
 0x1ff   :  { %2635 = shalt.err (!%p2632_p13)  }
 0x200   :  { %s2636_s18 = scalar_lea.vmem %s398_s0, 16  ;;  %p2641_p1 = scmp.lt.s32.totalorder %s398_s0, %s2921_s19 }
 0x201   :  { %p2637_p0 = scmp.ne.s32.totalorder %s398_s0, %s2636_s18  ;;  %p2642_p2 = scmp.lt.s32.totalorder %s2947_s15, %s2636_s18 }
 0x203   :  { %p2643_p3 = por %p2642_p2, %p2641_p1 }
 0x205   :  { %p2644_p4 = pnand %p2643_p3, %p2637_p0 }
 0x207   :  { %2647 = shalt.err (!%p2644_p4)  }
 0x208   :  { %400 = dma.hbm_to_vmem [thread:$0]  %s388_s5, 16, %s398_s0, [#allocation3] }
 0x264   :  { %v1969_v9 = vpop.f32.mrb[0].mxu0 }
 0x265   :  { %v1498_v22 = vpop.f32.mrb[1].mxu0 }
 0x266   :  { %v1903_v26 = vpop.f32.mrb[0].mxu1 }
 0x267   :  { %v2066_v39 = vadd.f32 %v1969_v9, %v1903_v26  ;;  %v964_v40 = vpop.f32.mrb[1].mxu1 }
 0x268   :  { %v2067_v41 = vadd.f32 %v1498_v22, %v964_v40 }
 0x269   :  { %2680 = dma.done.wait [#allocation3], 256 }
 0x26a   :  { %2681 = vsyncadd [#allocation3], 4294967040  ;;  %v1544_v42 = vld [vmem:[#allocation2] sm:$0xff]  ;;  %v1545_v43 = vld [vmem:[#allocation2 + $0x8] sm:$0xff]  ;;  %s2711_s1 = smov [#allocation17]  }
 0x26b   :  { %v1546_v44 = vadd.f32 %v2067_v41, %v1544_v42  ;;  %v1547_v45 = vadd.f32 %v2066_v39, %v1545_v43  ;;  %v1762_v1 = vld [vmem:[#allocation14] ss:$0 sm:$0xff]  ;;  %v1763_v3 = vld [vmem:[#allocation15] ss:$0 sm:$0xff]  ;;  %s1604_s19 = sshll.u32 %s2711_s1, 4  ;;  %s1605_s19 = int_to_ptr.vmem [resolvable:$true] %s1604_s19 }
 0x26c   :  { %s2648_s11 = scalar_lea.vmem %s1605_s19, 256  ;;  %p2653_p6 = scmp.lt.s32.totalorder %s1605_s19, %s1605_s19 }
 0x26d   :  { %v1548_v46 = vsel %vm439_vm0, %v1546_v44, 0.0  ;;  %v1551_v47 = vsel %vm439_vm0, %v1547_v45, 0.0  ;;  %p2649_p5 = scmp.ne.s32.totalorder %s1605_s19, %s2648_s11  ;;  %p2654_p7 = scmp.lt.s32.totalorder %s2648_s11, %s2648_s11 }
 0x26e   :  { %1549 = vadd.xlane.f32.xlu0 %v1548_v46 }
 0x26f   :  { %p2655_p8 = por %p2654_p7, %p2653_p6 }
 0x271   :  { %p2656_p9 = pnand %p2655_p8, %p2649_p5 }
 0x272   :  { %1552 = vadd.xlane.f32.xlu0 %v1551_v47 }
 0x2fb   :  { %v1550_v48 = vpop.xlane.xlu0 %1549 }
 0x2fc   :  { %v1555_v49 = vmul.f32 0.03125, %v1550_v48 }
 0x2fe   :  { %v1557_v50 = vsub.f32 %v1546_v44, %v1555_v49 }
 0x2ff   :  { %v1553_v51 = vpop.xlane.xlu0 %1552 }
 0x300   :  { %v1556_v52 = vmul.f32 0.03125, %v1553_v51  ;;  %v1559_v53 = vmul.f32 %v1557_v50, %v1557_v50 }
 0x302   :  { %v1558_v54 = vsub.f32 %v1547_v45, %v1556_v52  ;;  %v1561_v55 = vsel %vm439_vm0, %v1559_v53, 0.0 }
 0x303   :  { %1562 = vadd.xlane.f32.xlu1 %v1561_v55 }
 0x304   :  { %v1560_v56 = vmul.f32 %v1558_v54, %v1558_v54 }
 0x306   :  { %v1564_v57 = vsel %vm439_vm0, %v1560_v56, 0.0 }
 0x307   :  { %1565 = vadd.xlane.f32.xlu1 %v1564_v57 }
 0x390   :  { %v1563_v58 = vpop.xlane.xlu1 %1562 }
 0x391   :  { %v1567_v59 = vmul.f32 0.03125, %v1563_v58 }
 0x393   :  { %v1569_v60 = vadd.f32 1e-12, %v1567_v59 }
 0x394   :  { %v1566_v61 = vpop.xlane.xlu1 %1565 }
 0x395   :  { %2118 = vrsqrt.f32 %v1569_v60  ;;  %v1568_v62 = vmul.f32 0.03125, %v1566_v61 }
 0x397   :  { %v1570_v63 = vadd.f32 1e-12, %v1568_v62 }
 0x399   :  { %2120 = vrsqrt.f32 %v1570_v63 }
 0x39f   :  { %v2119_v0 = vpop.eup %2118 }
 0x3a0   :  { %v1573_v2 = vmul.f32 %v2119_v0, %v1557_v50 }
 0x3a2   :  { %v1582_v4 = vmul.f32 %v1762_v1, %v1573_v2 }
 0x3a3   :  { %v2121_v5 = vpop.eup %2120 }
 0x3a4   :  { %v1574_v6 = vmul.f32 %v2121_v5, %v1558_v54  ;;  %v1591_v7 = vadd.f32 %v1763_v3, %v1582_v4 }
 0x3a6   :  { %v1583_v8 = vmul.f32 %v1762_v1, %v1574_v6  ;;  %1593 = vst.msk [vmem:[#allocation17] sm:$0xff] %vm439_vm0, %v1591_v7 }
 0x3a8   :  { %v1592_v10 = vadd.f32 %v1763_v3, %v1583_v8 }
 0x3aa   :  { %1594 = vst.msk [vmem:[#allocation17 + $0x8] sm:$0xff] %vm439_vm0, %v1592_v10 }
 0x3ab   :  { %2659 = shalt.err (!%p2656_p9)
}
 0x3ac   :  { %s2660_s10 = scalar_lea.hbm %s3276_s8, 256 }
 0x3ad   :  { %p2661_p10 = scmp.ne.s32.totalorder %s3276_s8, %s2660_s10  ;;  %p2664_p11 = scmp.lt.u32.totalorder %s2660_s10, %s3276_s8 }
 0x3af   :  { %p2666_p12 = pnand %p2664_p11, %p2661_p10 }
 0x3b1   :  { %2669 = shalt.err (!%p2666_p12)
}
 0x3b2   :  { %1610 = dma.vmem_to_hbm [thread:$0]  %s1605_s19, 256, %s3276_s8, [#allocation8], %s2687_s26, %s2687_s26, %s2688_s27  }
 0x3b3   :  { %2682 = dma.done.wait [#allocation8], 256  }
 0x3b4   :  { %2683 = vsyncadd [#allocation8], 4294967040 }
 0x3b5   :  { %1614 = vsyncpa [#allocation7], 1 }
 0x3b6   :  { %1615 = vsyncpa [#allocation10], 1 }
 0x3b7   :  { %1616 = vsyncpa [#allocation13], 1 }
 0x3b8   :  { %1617 = vsyncpa [#allocation16], 1 }
 0x3b9   :  { %1618 = vsyncpa [#allocation8], 1 }
 0x3ba   :  { %1619 = vsyncmov [#allocation3] }
 0x3bd   :  { %s1620_s14 = vpop.sfrf %1619 }
 0x3be   :  { %p1764_p13 = scmp.ne.s32.totalorder %s1620_s14, 0 }
 0x3c0   :  { %1624 = shalt.err (%p1764_p13)  }
 0x3c1   :  { %1626 = vsyncmov [#allocation3 + $0x1] }
 0x3c4   :  { %s1627_s6 = vpop.sfrf %1626 }
 0x3c5   :  { %p1765_p0 = scmp.ne.s32.totalorder %s1627_s6, 0 }
 0x3c7   :  { %1631 = shalt.err (%p1765_p0)  }

</bundles_post_ra>
